<compile_context>
chip_gen: v7x
topology: tpu7x:2x2x1
jax: 0.10.0
libtpu: 0.0.40
codegen_flags: <defaults>
</compile_context>

<pallas_src>
import functools

import jax
import jax.numpy as jnp
from jax.experimental import pallas as pl
from jax.experimental.pallas import tpu as pltpu

_SUBLANE = 8
_LANE = 128


def _round_up(x, m):
    return ((x + m - 1) // m) * m


# ----------------------------------------------------------------------------
# Fused kernel
# ----------------------------------------------------------------------------
def _make_fused_kernel(num_layers, T, B_pad, H):
    """Fused (num_layers x LSTM) + Linear kernel.

    Ref order: x_rows, (w_ih, w_hh, bias) * num_layers, w_fc, b_fc, out, rows.
      x_rows: (T*B_pad, Din)  time-major input rows, row index = t*B_pad + b
      w_ih:   (Din_l, 4H)     pre-transposed
      w_hh:   (H, 4H)         pre-transposed
      bias:   (1, 4H)         b_ih + b_hh
      w_fc:   (H, O_pad)      pre-transposed, lane-padded
      b_fc:   (1, O_pad)
      out:    (B_pad, O_pad)
      rows:   (T*B_pad, H)    VMEM scratch: previous layer's hidden sequence
    """

    def kernel(*refs):
        x_ref = refs[0]
        layer_refs = refs[1:1 + 3 * num_layers]
        wfc_ref = refs[1 + 3 * num_layers]
        bfc_ref = refs[2 + 3 * num_layers]
        out_ref = refs[3 + 3 * num_layers]
        rows_ref = refs[4 + 3 * num_layers]

        h_last = None
        for layer in range(num_layers):
            w_ih = layer_refs[3 * layer][...]                  # (Din_l, 4H)
            w_hh = layer_refs[3 * layer + 1][...]              # (H, 4H)
            bias = layer_refs[3 * layer + 2][...]              # (1, 4H)

            # Layer 0 reads the time-major input rows; later layers read the
            # previous layer's hidden sequence from the VMEM scratch.
            if layer == 0:
                in_rows = x_ref[...].astype(jnp.float32)       # (T*B_pad, Din)
            else:
                in_rows = rows_ref[...]                        # (T*B_pad, H)

            # Hoisted input projection: ONE matmul for all timesteps.
            gx = jnp.dot(in_rows, w_ih,
                         preferred_element_type=jnp.float32) + bias  # (T*B_pad, 4H)

            h = jnp.zeros((B_pad, H), jnp.float32)
            c = jnp.zeros((B_pad, H), jnp.float32)
            write_rows = layer + 1 < num_layers
            for t in range(T):
                # Static slice on an 8-sublane boundary: whole-vreg extract.
                gates = gx[t * B_pad:(t + 1) * B_pad, :] + jnp.dot(
                    h, w_hh, preferred_element_type=jnp.float32)      # (B_pad, 4H)
                # Full-slab transcendentals (one (8,128) vreg here), static
                # lane slices for the quarters. PyTorch gate order: i, f, g, o.
                sig = jax.nn.sigmoid(gates)
                tnh = jnp.tanh(gates)
                i_g = sig[:, 0 * H:1 * H]
                f_g = sig[:, 1 * H:2 * H]
                g_g = tnh[:, 2 * H:3 * H]
                o_g = sig[:, 3 * H:4 * H]
                c = f_g * c + i_g * g_g
                h = o_g * jnp.tanh(c)
                if write_rows:
                    # Hidden sequence stays on-chip for the next layer.
                    rows_ref[pl.ds(t * B_pad, B_pad), :] = h
            h_last = h

        # Final fully-connected layer on the last timestep of the top layer.
        out = jnp.dot(h_last, wfc_ref[...],
                      preferred_element_type=jnp.float32) + bfc_ref[...]
        out_ref[...] = out.astype(out_ref.dtype)

    return kernel


def _full_block_spec(shape):
    n = len(shape)
    return pl.BlockSpec(shape, lambda *args: (0,) * n)


# ----------------------------------------------------------------------------
# Wrapper
# ----------------------------------------------------------------------------
@functools.partial(jax.jit, static_argnames=("num_layers",))
def lstm_forward(x_btd, params, num_layers):
    """Equivalent of LSTM.forward (eval): x_btd is batch-first (B, T, input)."""
    B, T, Din = x_btd.shape
    layer_params = [params[f"layer_{l}"] for l in range(num_layers)]
    w_fc_t, b_fc = params["fc"]
    H = layer_params[0][1].shape[0]
    O = w_fc_t.shape[1]

    B_pad = max(_SUBLANE, _round_up(B, _SUBLANE))
    O_pad = max(_LANE, _round_up(O, _LANE))

    # Time-major, batch-padded input rows: row index = t*B_pad + b.
    x_tm = jnp.swapaxes(x_btd, 0, 1)                            # (T, B, Din)
    x_tm = jnp.pad(x_tm, ((0, 0), (0, B_pad - B), (0, 0)))      # (T, B_pad, Din)
    x_rows = x_tm.reshape(T * B_pad, Din)

    # Lane-dense FC output: pad O to a multiple of 128, slice afterwards.
    w_fc_p = jnp.pad(w_fc_t, ((0, 0), (0, O_pad - O)))          # (H, O_pad)
    b_fc_p = jnp.pad(b_fc, ((0, 0), (0, O_pad - O)))            # (1, O_pad)

    flat_inputs = [x_rows]
    for (w_ih_t, w_hh_t, bias) in layer_params:
        flat_inputs += [w_ih_t, w_hh_t, bias]
    flat_inputs += [w_fc_p, b_fc_p]

    kernel = _make_fused_kernel(num_layers, T, B_pad, H)
    out_pad = pl.pallas_call(
        kernel,
        out_shape=jax.ShapeDtypeStruct((B_pad, O_pad), x_btd.dtype),
        in_specs=[_full_block_spec(a.shape) for a in flat_inputs],
        out_specs=_full_block_spec((B_pad, O_pad)),
        scratch_shapes=[pltpu.VMEM((T * B_pad, H), jnp.float32)],
        compiler_params=pltpu.CompilerParams(vmem_limit_bytes=32 * 1024 * 1024),
    )(*flat_inputs)
    return out_pad[:B, :O]


# ----------------------------------------------------------------------------
# Parameters & pure-JAX reference (f32, HIGHEST precision)
# ----------------------------------------------------------------------------
def init_params(key, input_size, hidden_size, num_layers, output_size):
    """Deterministic synthetic parameters matching nn.LSTM / nn.Linear shapes."""
    params = {}
    H = hidden_size
    bound = 1.0 / jnp.sqrt(jnp.asarray(H, jnp.float32))
    for layer in range(num_layers):
        d_in = input_size if layer == 0 else hidden_size
        key, k1, k2, k3, k4 = jax.random.split(key, 5)
        # PyTorch stores weight_ih (4H, d_in) / weight_hh (4H, H); pre-transpose.
        w_ih = jax.random.uniform(k1, (4 * H, d_in), jnp.float32, -bound, bound)
        w_hh = jax.random.uniform(k2, (4 * H, H), jnp.float32, -bound, bound)
        b_ih = jax.random.uniform(k3, (4 * H,), jnp.float32, -bound, bound)
        b_hh = jax.random.uniform(k4, (4 * H,), jnp.float32, -bound, bound)
        params[f"layer_{layer}"] = (
            w_ih.T,                      # (d_in, 4H)
            w_hh.T,                      # (H, 4H)
            (b_ih + b_hh)[None, :],      # (1, 4H)
        )
    key, k5, k6 = jax.random.split(key, 3)
    fc_bound = 1.0 / jnp.sqrt(jnp.asarray(H, jnp.float32))
    w_fc = jax.random.uniform(k5, (output_size, H), jnp.float32, -fc_bound, fc_bound)
    b_fc = jax.random.uniform(k6, (output_size,), jnp.float32, -fc_bound, fc_bound)
    params["fc"] = (w_fc.T, b_fc[None, :])  # (H, O), (1, O)
    return params


def lstm_reference(x_btd, params, num_layers):
    """Pure-JAX eval-mode reference (no dropout), f32 HIGHEST-precision dots."""
    hp = jax.lax.Precision.HIGHEST
    B, T, _ = x_btd.shape
    seq = x_btd.astype(jnp.float32)
    for layer in range(num_layers):
        w_ih_t, w_hh_t, bias = params[f"layer_{layer}"]
        H = w_hh_t.shape[0]
        h = jnp.zeros((B, H), jnp.float32)
        c = jnp.zeros((B, H), jnp.float32)
        hs = []
        for t in range(T):
            g = (jnp.dot(seq[:, t, :], w_ih_t, precision=hp)
                 + jnp.dot(h, w_hh_t, precision=hp) + bias)
            i_g = jax.nn.sigmoid(g[:, 0 * H:1 * H])
            f_g = jax.nn.sigmoid(g[:, 1 * H:2 * H])
            g_g = jnp.tanh(g[:, 2 * H:3 * H])
            o_g = jax.nn.sigmoid(g[:, 3 * H:4 * H])
            c = f_g * c + i_g * g_g
            h = o_g * jnp.tanh(c)
            hs.append(h)
        seq = jnp.stack(hs, axis=1)
    w_fc_t, b_fc = params["fc"]
    return jnp.dot(seq[:, -1, :], w_fc_t, precision=hp) + b_fc


if __name__ == "__main__":
    # Small shapes consistent with the module's forward:
    #   x: (batch=2, seq=8, input_size=8), hidden_size=32, num_layers=2, output=4
    input_size, hidden_size, num_layers, output_size = 8, 32, 2, 4
    batch, seq_len = 2, 8

    key = jax.random.PRNGKey(0)
    key, kx = jax.random.split(key)
    x = jax.random.normal(kx, (batch, seq_len, input_size), dtype=jnp.float32)

    params = init_params(key, input_size, hidden_size, num_layers, output_size)

    out = lstm_forward(x, params, num_layers)
    out = jax.block_until_ready(out)
    assert out.shape == (batch, output_size), out.shape

    ref = lstm_reference(x, params, num_layers)
    err = float(jnp.max(jnp.abs(out - ref)))
    assert err < 1e-3, f"max abs err vs f32 reference: {err}"
    print("KERNEL_OK")
</pallas_src>

<mosaic_0001>
module attributes {stable_mosaic.version = 11 : i64} {
  func.func @kernel(%arg0: memref<64x8xf32, #tpu.memory_space<vmem>>, %arg1: memref<8x128xf32, #tpu.memory_space<vmem>>, %arg2: memref<32x128xf32, #tpu.memory_space<vmem>>, %arg3: memref<1x128xf32, #tpu.memory_space<vmem>>, %arg4: memref<32x128xf32, #tpu.memory_space<vmem>>, %arg5: memref<32x128xf32, #tpu.memory_space<vmem>>, %arg6: memref<1x128xf32, #tpu.memory_space<vmem>>, %arg7: memref<32x128xf32, #tpu.memory_space<vmem>>, %arg8: memref<1x128xf32, #tpu.memory_space<vmem>>, %arg9: memref<8x128xf32, #tpu.memory_space<vmem>>, %arg10: memref<64x32xf32, #tpu.memory_space<vmem>>) attributes {dimension_semantics = [], scalar_prefetch = 0 : i64, scratch_operands = 1 : i64, tpu.core_type = #tpu.core_type<tc>} {
    %c0 = arith.constant 0 : index
    %c0_0 = arith.constant 0 : index
    %0 = vector.load %arg1[%c0, %c0_0] : memref<8x128xf32, #tpu.memory_space<vmem>>, vector<8x128xf32>
    %c0_1 = arith.constant 0 : index
    %c0_2 = arith.constant 0 : index
    %1 = vector.load %arg2[%c0_1, %c0_2] : memref<32x128xf32, #tpu.memory_space<vmem>>, vector<32x128xf32>
    %c0_3 = arith.constant 0 : index
    %c0_4 = arith.constant 0 : index
    %2 = vector.load %arg3[%c0_3, %c0_4] : memref<1x128xf32, #tpu.memory_space<vmem>>, vector<1x128xf32>
    %c0_5 = arith.constant 0 : index
    %c0_6 = arith.constant 0 : index
    %3 = vector.load %arg0[%c0_5, %c0_6] : memref<64x8xf32, #tpu.memory_space<vmem>>, vector<64x8xf32>
    %cst = arith.constant dense<0.000000e+00> : vector<64x128xf32>
    %4 = tpu.matmul %3, %0, %cst {dimension_numbers = #tpu.dot_dimension_numbers<[1], [0], [0], [1], [0, 0, 1, 1], [], []>} : vector<64x8xf32>, vector<8x128xf32>, vector<64x128xf32> -> vector<64x128xf32>
    %5 = vector.broadcast %2 : vector<1x128xf32> to vector<64x128xf32>
    %6 = arith.addf %4, %5 : vector<64x128xf32>
    %cst_7 = arith.constant 0.000000e+00 : f32
    %7 = vector.broadcast %cst_7 : f32 to vector<8x32xf32>
    %cst_8 = arith.constant 0.000000e+00 : f32
    %8 = vector.broadcast %cst_8 : f32 to vector<8x32xf32>
    %9 = vector.extract_strided_slice %6 {offsets = [0, 0], sizes = [8, 128], strides = [1, 1]} : vector<64x128xf32> to vector<8x128xf32>
    %cst_9 = arith.constant dense<0.000000e+00> : vector<8x128xf32>
    %10 = tpu.matmul %7, %1, %cst_9 {dimension_numbers = #tpu.dot_dimension_numbers<[1], [0], [0], [1], [0, 0, 1, 1], [], []>} : vector<8x32xf32>, vector<32x128xf32>, vector<8x128xf32> -> vector<8x128xf32>
    %11 = arith.addf %9, %10 : vector<8x128xf32>
    %12 = arith.negf %11 : vector<8x128xf32>
    %13 = math.exp %12 : vector<8x128xf32>
    %cst_10 = arith.constant 1.000000e+00 : f32
    %14 = vector.broadcast %cst_10 : f32 to vector<8x128xf32>
    %15 = arith.addf %14, %13 : vector<8x128xf32>
    %16 = arith.divf %14, %15 : vector<8x128xf32>
    %17 = math.tanh %11 : vector<8x128xf32>
    %18 = vector.extract_strided_slice %16 {offsets = [0, 0], sizes = [8, 32], strides = [1, 1]} : vector<8x128xf32> to vector<8x32xf32>
    %19 = vector.extract_strided_slice %16 {offsets = [0, 32], sizes = [8, 32], strides = [1, 1]} : vector<8x128xf32> to vector<8x32xf32>
    %20 = vector.extract_strided_slice %17 {offsets = [0, 64], sizes = [8, 32], strides = [1, 1]} : vector<8x128xf32> to vector<8x32xf32>
    %21 = vector.extract_strided_slice %16 {offsets = [0, 96], sizes = [8, 32], strides = [1, 1]} : vector<8x128xf32> to vector<8x32xf32>
    %22 = arith.mulf %19, %8 : vector<8x32xf32>
    %23 = arith.mulf %18, %20 : vector<8x32xf32>
    %24 = arith.addf %22, %23 : vector<8x32xf32>
    %25 = math.tanh %24 : vector<8x32xf32>
    %26 = arith.mulf %21, %25 : vector<8x32xf32>
    %c0_11 = arith.constant 0 : index
    %c0_12 = arith.constant 0 : index
    %27 = vector.load %arg10[%c0_11, %c0_12] : memref<64x32xf32, #tpu.memory_space<vmem>>, vector<8x32xf32>
    tpu.vector_store %arg10[%c0_11, %c0_12], %26 {strides = array<i32>} : memref<64x32xf32, #tpu.memory_space<vmem>>, vector<8x32xf32>,
    %28 = vector.extract_strided_slice %6 {offsets = [8, 0], sizes = [8, 128], strides = [1, 1]} : vector<64x128xf32> to vector<8x128xf32>
    %cst_13 = arith.constant dense<0.000000e+00> : vector<8x128xf32>
    %29 = tpu.matmul %26, %1, %cst_13 {dimension_numbers = #tpu.dot_dimension_numbers<[1], [0], [0], [1], [0, 0, 1, 1], [], []>} : vector<8x32xf32>, vector<32x128xf32>, vector<8x128xf32> -> vector<8x128xf32>
    %30 = arith.addf %28, %29 : vector<8x128xf32>
    %31 = arith.negf %30 : vector<8x128xf32>
    %32 = math.exp %31 : vector<8x128xf32>
    %cst_14 = arith.constant 1.000000e+00 : f32
    %33 = vector.broadcast %cst_14 : f32 to vector<8x128xf32>
    %34 = arith.addf %33, %32 : vector<8x128xf32>
    %35 = arith.divf %33, %34 : vector<8x128xf32>
    %36 = math.tanh %30 : vector<8x128xf32>
    %37 = vector.extract_strided_slice %35 {offsets = [0, 0], sizes = [8, 32], strides = [1, 1]} : vector<8x128xf32> to vector<8x32xf32>
    %38 = vector.extract_strided_slice %35 {offsets = [0, 32], sizes = [8, 32], strides = [1, 1]} : vector<8x128xf32> to vector<8x32xf32>
    %39 = vector.extract_strided_slice %36 {offsets = [0, 64], sizes = [8, 32], strides = [1, 1]} : vector<8x128xf32> to vector<8x32xf32>
    %40 = vector.extract_strided_slice %35 {offsets = [0, 96], sizes = [8, 32], strides = [1, 1]} : vector<8x128xf32> to vector<8x32xf32>
    %41 = arith.mulf %38, %24 : vector<8x32xf32>
    %42 = arith.mulf %37, %39 : vector<8x32xf32>
    %43 = arith.addf %41, %42 : vector<8x32xf32>
    %44 = math.tanh %43 : vector<8x32xf32>
    %45 = arith.mulf %40, %44 : vector<8x32xf32>
    %c8 = arith.constant 8 : index
    %c0_15 = arith.constant 0 : index
    %46 = vector.load %arg10[%c8, %c0_15] : memref<64x32xf32, #tpu.memory_space<vmem>>, vector<8x32xf32>
    tpu.vector_store %arg10[%c8, %c0_15], %45 {strides = array<i32>} : memref<64x32xf32, #tpu.memory_space<vmem>>, vector<8x32xf32>,
    %47 = vector.extract_strided_slice %6 {offsets = [16, 0], sizes = [8, 128], strides = [1, 1]} : vector<64x128xf32> to vector<8x128xf32>
    %cst_16 = arith.constant dense<0.000000e+00> : vector<8x128xf32>
    %48 = tpu.matmul %45, %1, %cst_16 {dimension_numbers = #tpu.dot_dimension_numbers<[1], [0], [0], [1], [0, 0, 1, 1], [], []>} : vector<8x32xf32>, vector<32x128xf32>, vector<8x128xf32> -> vector<8x128xf32>
    %49 = arith.addf %47, %48 : vector<8x128xf32>
    %50 = arith.negf %49 : vector<8x128xf32>
    %51 = math.exp %50 : vector<8x128xf32>
    %cst_17 = arith.constant 1.000000e+00 : f32
    %52 = vector.broadcast %cst_17 : f32 to vector<8x128xf32>
    %53 = arith.addf %52, %51 : vector<8x128xf32>
    %54 = arith.divf %52, %53 : vector<8x128xf32>
    %55 = math.tanh %49 : vector<8x128xf32>
    %56 = vector.extract_strided_slice %54 {offsets = [0, 0], sizes = [8, 32], strides = [1, 1]} : vector<8x128xf32> to vector<8x32xf32>
    %57 = vector.extract_strided_slice %54 {offsets = [0, 32], sizes = [8, 32], strides = [1, 1]} : vector<8x128xf32> to vector<8x32xf32>
    %58 = vector.extract_strided_slice %55 {offsets = [0, 64], sizes = [8, 32], strides = [1, 1]} : vector<8x128xf32> to vector<8x32xf32>
    %59 = vector.extract_strided_slice %54 {offsets = [0, 96], sizes = [8, 32], strides = [1, 1]} : vector<8x128xf32> to vector<8x32xf32>
    %60 = arith.mulf %57, %43 : vector<8x32xf32>
    %61 = arith.mulf %56, %58 : vector<8x32xf32>
    %62 = arith.addf %60, %61 : vector<8x32xf32>
    %63 = math.tanh %62 : vector<8x32xf32>
    %64 = arith.mulf %59, %63 : vector<8x32xf32>
    %c16 = arith.constant 16 : index
    %c0_18 = arith.constant 0 : index
    %65 = vector.load %arg10[%c16, %c0_18] : memref<64x32xf32, #tpu.memory_space<vmem>>, vector<8x32xf32>
    tpu.vector_store %arg10[%c16, %c0_18], %64 {strides = array<i32>} : memref<64x32xf32, #tpu.memory_space<vmem>>, vector<8x32xf32>,
    %66 = vector.extract_strided_slice %6 {offsets = [24, 0], sizes = [8, 128], strides = [1, 1]} : vector<64x128xf32> to vector<8x128xf32>
    %cst_19 = arith.constant dense<0.000000e+00> : vector<8x128xf32>
    %67 = tpu.matmul %64, %1, %cst_19 {dimension_numbers = #tpu.dot_dimension_numbers<[1], [0], [0], [1], [0, 0, 1, 1], [], []>} : vector<8x32xf32>, vector<32x128xf32>, vector<8x128xf32> -> vector<8x128xf32>
    %68 = arith.addf %66, %67 : vector<8x128xf32>
    %69 = arith.negf %68 : vector<8x128xf32>
    %70 = math.exp %69 : vector<8x128xf32>
    %cst_20 = arith.constant 1.000000e+00 : f32
    %71 = vector.broadcast %cst_20 : f32 to vector<8x128xf32>
    %72 = arith.addf %71, %70 : vector<8x128xf32>
    %73 = arith.divf %71, %72 : vector<8x128xf32>
    %74 = math.tanh %68 : vector<8x128xf32>
    %75 = vector.extract_strided_slice %73 {offsets = [0, 0], sizes = [8, 32], strides = [1, 1]} : vector<8x128xf32> to vector<8x32xf32>
    %76 = vector.extract_strided_slice %73 {offsets = [0, 32], sizes = [8, 32], strides = [1, 1]} : vector<8x128xf32> to vector<8x32xf32>
    %77 = vector.extract_strided_slice %74 {offsets = [0, 64], sizes = [8, 32], strides = [1, 1]} : vector<8x128xf32> to vector<8x32xf32>
    %78 = vector.extract_strided_slice %73 {offsets = [0, 96], sizes = [8, 32], strides = [1, 1]} : vector<8x128xf32> to vector<8x32xf32>
    %79 = arith.mulf %76, %62 : vector<8x32xf32>
    %80 = arith.mulf %75, %77 : vector<8x32xf32>
    %81 = arith.addf %79, %80 : vector<8x32xf32>
    %82 = math.tanh %81 : vector<8x32xf32>
    %83 = arith.mulf %78, %82 : vector<8x32xf32>
    %c24 = arith.constant 24 : index
    %c0_21 = arith.constant 0 : index
    %84 = vector.load %arg10[%c24, %c0_21] : memref<64x32xf32, #tpu.memory_space<vmem>>, vector<8x32xf32>
    tpu.vector_store %arg10[%c24, %c0_21], %83 {strides = array<i32>} : memref<64x32xf32, #tpu.memory_space<vmem>>, vector<8x32xf32>,
    %85 = vector.extract_strided_slice %6 {offsets = [32, 0], sizes = [8, 128], strides = [1, 1]} : vector<64x128xf32> to vector<8x128xf32>
    %cst_22 = arith.constant dense<0.000000e+00> : vector<8x128xf32>
    %86 = tpu.matmul %83, %1, %cst_22 {dimension_numbers = #tpu.dot_dimension_numbers<[1], [0], [0], [1], [0, 0, 1, 1], [], []>} : vector<8x32xf32>, vector<32x128xf32>, vector<8x128xf32> -> vector<8x128xf32>
    %87 = arith.addf %85, %86 : vector<8x128xf32>
    %88 = arith.negf %87 : vector<8x128xf32>
    %89 = math.exp %88 : vector<8x128xf32>
    %cst_23 = arith.constant 1.000000e+00 : f32
    %90 = vector.broadcast %cst_23 : f32 to vector<8x128xf32>
    %91 = arith.addf %90, %89 : vector<8x128xf32>
    %92 = arith.divf %90, %91 : vector<8x128xf32>
    %93 = math.tanh %87 : vector<8x128xf32>
    %94 = vector.extract_strided_slice %92 {offsets = [0, 0], sizes = [8, 32], strides = [1, 1]} : vector<8x128xf32> to vector<8x32xf32>
    %95 = vector.extract_strided_slice %92 {offsets = [0, 32], sizes = [8, 32], strides = [1, 1]} : vector<8x128xf32> to vector<8x32xf32>
    %96 = vector.extract_strided_slice %93 {offsets = [0, 64], sizes = [8, 32], strides = [1, 1]} : vector<8x128xf32> to vector<8x32xf32>
    %97 = vector.extract_strided_slice %92 {offsets = [0, 96], sizes = [8, 32], strides = [1, 1]} : vector<8x128xf32> to vector<8x32xf32>
    %98 = arith.mulf %95, %81 : vector<8x32xf32>
    %99 = arith.mulf %94, %96 : vector<8x32xf32>
    %100 = arith.addf %98, %99 : vector<8x32xf32>
    %101 = math.tanh %100 : vector<8x32xf32>
    %102 = arith.mulf %97, %101 : vector<8x32xf32>
    %c32 = arith.constant 32 : index
    %c0_24 = arith.constant 0 : index
    %103 = vector.load %arg10[%c32, %c0_24] : memref<64x32xf32, #tpu.memory_space<vmem>>, vector<8x32xf32>
    tpu.vector_store %arg10[%c32, %c0_24], %102 {strides = array<i32>} : memref<64x32xf32, #tpu.memory_space<vmem>>, vector<8x32xf32>,
    %104 = vector.extract_strided_slice %6 {offsets = [40, 0], sizes = [8, 128], strides = [1, 1]} : vector<64x128xf32> to vector<8x128xf32>
    %cst_25 = arith.constant dense<0.000000e+00> : vector<8x128xf32>
    %105 = tpu.matmul %102, %1, %cst_25 {dimension_numbers = #tpu.dot_dimension_numbers<[1], [0], [0], [1], [0, 0, 1, 1], [], []>} : vector<8x32xf32>, vector<32x128xf32>, vector<8x128xf32> -> vector<8x128xf32>
    %106 = arith.addf %104, %105 : vector<8x128xf32>
    %107 = arith.negf %106 : vector<8x128xf32>
    %108 = math.exp %107 : vector<8x128xf32>
    %cst_26 = arith.constant 1.000000e+00 : f32
    %109 = vector.broadcast %cst_26 : f32 to vector<8x128xf32>
    %110 = arith.addf %109, %108 : vector<8x128xf32>
    %111 = arith.divf %109, %110 : vector<8x128xf32>
    %112 = math.tanh %106 : vector<8x128xf32>
    %113 = vector.extract_strided_slice %111 {offsets = [0, 0], sizes = [8, 32], strides = [1, 1]} : vector<8x128xf32> to vector<8x32xf32>
    %114 = vector.extract_strided_slice %111 {offsets = [0, 32], sizes = [8, 32], strides = [1, 1]} : vector<8x128xf32> to vector<8x32xf32>
    %115 = vector.extract_strided_slice %112 {offsets = [0, 64], sizes = [8, 32], strides = [1, 1]} : vector<8x128xf32> to vector<8x32xf32>
    %116 = vector.extract_strided_slice %111 {offsets = [0, 96], sizes = [8, 32], strides = [1, 1]} : vector<8x128xf32> to vector<8x32xf32>
    %117 = arith.mulf %114, %100 : vector<8x32xf32>
    %118 = arith.mulf %113, %115 : vector<8x32xf32>
    %119 = arith.addf %117, %118 : vector<8x32xf32>
    %120 = math.tanh %119 : vector<8x32xf32>
    %121 = arith.mulf %116, %120 : vector<8x32xf32>
    %c40 = arith.constant 40 : index
    %c0_27 = arith.constant 0 : index
    %122 = vector.load %arg10[%c40, %c0_27] : memref<64x32xf32, #tpu.memory_space<vmem>>, vector<8x32xf32>
    tpu.vector_store %arg10[%c40, %c0_27], %121 {strides = array<i32>} : memref<64x32xf32, #tpu.memory_space<vmem>>, vector<8x32xf32>,
    %123 = vector.extract_strided_slice %6 {offsets = [48, 0], sizes = [8, 128], strides = [1, 1]} : vector<64x128xf32> to vector<8x128xf32>
    %cst_28 = arith.constant dense<0.000000e+00> : vector<8x128xf32>
    %124 = tpu.matmul %121, %1, %cst_28 {dimension_numbers = #tpu.dot_dimension_numbers<[1], [0], [0], [1], [0, 0, 1, 1], [], []>} : vector<8x32xf32>, vector<32x128xf32>, vector<8x128xf32> -> vector<8x128xf32>
    %125 = arith.addf %123, %124 : vector<8x128xf32>
    %126 = arith.negf %125 : vector<8x128xf32>
    %127 = math.exp %126 : vector<8x128xf32>
    %cst_29 = arith.constant 1.000000e+00 : f32
    %128 = vector.broadcast %cst_29 : f32 to vector<8x128xf32>
    %129 = arith.addf %128, %127 : vector<8x128xf32>
    %130 = arith.divf %128, %129 : vector<8x128xf32>
    %131 = math.tanh %125 : vector<8x128xf32>
    %132 = vector.extract_strided_slice %130 {offsets = [0, 0], sizes = [8, 32], strides = [1, 1]} : vector<8x128xf32> to vector<8x32xf32>
    %133 = vector.extract_strided_slice %130 {offsets = [0, 32], sizes = [8, 32], strides = [1, 1]} : vector<8x128xf32> to vector<8x32xf32>
    %134 = vector.extract_strided_slice %131 {offsets = [0, 64], sizes = [8, 32], strides = [1, 1]} : vector<8x128xf32> to vector<8x32xf32>
    %135 = vector.extract_strided_slice %130 {offsets = [0, 96], sizes = [8, 32], strides = [1, 1]} : vector<8x128xf32> to vector<8x32xf32>
    %136 = arith.mulf %133, %119 : vector<8x32xf32>
    %137 = arith.mulf %132, %134 : vector<8x32xf32>
    %138 = arith.addf %136, %137 : vector<8x32xf32>
    %139 = math.tanh %138 : vector<8x32xf32>
    %140 = arith.mulf %135, %139 : vector<8x32xf32>
    %c48 = arith.constant 48 : index
    %c0_30 = arith.constant 0 : index
    %141 = vector.load %arg10[%c48, %c0_30] : memref<64x32xf32, #tpu.memory_space<vmem>>, vector<8x32xf32>
    tpu.vector_store %arg10[%c48, %c0_30], %140 {strides = array<i32>} : memref<64x32xf32, #tpu.memory_space<vmem>>, vector<8x32xf32>,
    %142 = vector.extract_strided_slice %6 {offsets = [56, 0], sizes = [8, 128], strides = [1, 1]} : vector<64x128xf32> to vector<8x128xf32>
    %cst_31 = arith.constant dense<0.000000e+00> : vector<8x128xf32>
    %143 = tpu.matmul %140, %1, %cst_31 {dimension_numbers = #tpu.dot_dimension_numbers<[1], [0], [0], [1], [0, 0, 1, 1], [], []>} : vector<8x32xf32>, vector<32x128xf32>, vector<8x128xf32> -> vector<8x128xf32>
    %144 = arith.addf %142, %143 : vector<8x128xf32>
    %145 = arith.negf %144 : vector<8x128xf32>
    %146 = math.exp %145 : vector<8x128xf32>
    %cst_32 = arith.constant 1.000000e+00 : f32
    %147 = vector.broadcast %cst_32 : f32 to vector<8x128xf32>
    %148 = arith.addf %147, %146 : vector<8x128xf32>
    %149 = arith.divf %147, %148 : vector<8x128xf32>
    %150 = math.tanh %144 : vector<8x128xf32>
    %151 = vector.extract_strided_slice %149 {offsets = [0, 0], sizes = [8, 32], strides = [1, 1]} : vector<8x128xf32> to vector<8x32xf32>
    %152 = vector.extract_strided_slice %149 {offsets = [0, 32], sizes = [8, 32], strides = [1, 1]} : vector<8x128xf32> to vector<8x32xf32>
    %153 = vector.extract_strided_slice %150 {offsets = [0, 64], sizes = [8, 32], strides = [1, 1]} : vector<8x128xf32> to vector<8x32xf32>
    %154 = vector.extract_strided_slice %149 {offsets = [0, 96], sizes = [8, 32], strides = [1, 1]} : vector<8x128xf32> to vector<8x32xf32>
    %155 = arith.mulf %152, %138 : vector<8x32xf32>
    %156 = arith.mulf %151, %153 : vector<8x32xf32>
    %157 = arith.addf %155, %156 : vector<8x32xf32>
    %158 = math.tanh %157 : vector<8x32xf32>
    %159 = arith.mulf %154, %158 : vector<8x32xf32>
    %c56 = arith.constant 56 : index
    %c0_33 = arith.constant 0 : index
    %160 = vector.load %arg10[%c56, %c0_33] : memref<64x32xf32, #tpu.memory_space<vmem>>, vector<8x32xf32>
    tpu.vector_store %arg10[%c56, %c0_33], %159 {strides = array<i32>} : memref<64x32xf32, #tpu.memory_space<vmem>>, vector<8x32xf32>,
    %c0_34 = arith.constant 0 : index
    %c0_35 = arith.constant 0 : index
    %161 = vector.load %arg4[%c0_34, %c0_35] : memref<32x128xf32, #tpu.memory_space<vmem>>, vector<32x128xf32>
    %c0_36 = arith.constant 0 : index
    %c0_37 = arith.constant 0 : index
    %162 = vector.load %arg5[%c0_36, %c0_37] : memref<32x128xf32, #tpu.memory_space<vmem>>, vector<32x128xf32>
    %c0_38 = arith.constant 0 : index
    %c0_39 = arith.constant 0 : index
    %163 = vector.load %arg6[%c0_38, %c0_39] : memref<1x128xf32, #tpu.memory_space<vmem>>, vector<1x128xf32>
    %c0_40 = arith.constant 0 : index
    %c0_41 = arith.constant 0 : index
    %164 = vector.load %arg10[%c0_40, %c0_41] : memref<64x32xf32, #tpu.memory_space<vmem>>, vector<64x32xf32>
    %cst_42 = arith.constant dense<0.000000e+00> : vector<64x128xf32>
    %165 = tpu.matmul %164, %161, %cst_42 {dimension_numbers = #tpu.dot_dimension_numbers<[1], [0], [0], [1], [0, 0, 1, 1], [], []>} : vector<64x32xf32>, vector<32x128xf32>, vector<64x128xf32> -> vector<64x128xf32>
    %166 = vector.broadcast %163 : vector<1x128xf32> to vector<64x128xf32>
    %167 = arith.addf %165, %166 : vector<64x128xf32>
    %cst_43 = arith.constant 0.000000e+00 : f32
    %168 = vector.broadcast %cst_43 : f32 to vector<8x32xf32>
    %cst_44 = arith.constant 0.000000e+00 : f32
    %169 = vector.broadcast %cst_44 : f32 to vector<8x32xf32>
    %170 = vector.extract_strided_slice %167 {offsets = [0, 0], sizes = [8, 128], strides = [1, 1]} : vector<64x128xf32> to vector<8x128xf32>
    %cst_45 = arith.constant dense<0.000000e+00> : vector<8x128xf32>
    %171 = tpu.matmul %168, %162, %cst_45 {dimension_numbers = #tpu.dot_dimension_numbers<[1], [0], [0], [1], [0, 0, 1, 1], [], []>} : vector<8x32xf32>, vector<32x128xf32>, vector<8x128xf32> -> vector<8x128xf32>
    %172 = arith.addf %170, %171 : vector<8x128xf32>
    %173 = arith.negf %172 : vector<8x128xf32>
    %174 = math.exp %173 : vector<8x128xf32>
    %cst_46 = arith.constant 1.000000e+00 : f32
    %175 = vector.broadcast %cst_46 : f32 to vector<8x128xf32>
    %176 = arith.addf %175, %174 : vector<8x128xf32>
    %177 = arith.divf %175, %176 : vector<8x128xf32>
    %178 = math.tanh %172 : vector<8x128xf32>
    %179 = vector.extract_strided_slice %177 {offsets = [0, 0], sizes = [8, 32], strides = [1, 1]} : vector<8x128xf32> to vector<8x32xf32>
    %180 = vector.extract_strided_slice %177 {offsets = [0, 32], sizes = [8, 32], strides = [1, 1]} : vector<8x128xf32> to vector<8x32xf32>
    %181 = vector.extract_strided_slice %178 {offsets = [0, 64], sizes = [8, 32], strides = [1, 1]} : vector<8x128xf32> to vector<8x32xf32>
    %182 = vector.extract_strided_slice %177 {offsets = [0, 96], sizes = [8, 32], strides = [1, 1]} : vector<8x128xf32> to vector<8x32xf32>
    %183 = arith.mulf %180, %169 : vector<8x32xf32>
    %184 = arith.mulf %179, %181 : vector<8x32xf32>
    %185 = arith.addf %183, %184 : vector<8x32xf32>
    %186 = math.tanh %185 : vector<8x32xf32>
    %187 = arith.mulf %182, %186 : vector<8x32xf32>
    %188 = vector.extract_strided_slice %167 {offsets = [8, 0], sizes = [8, 128], strides = [1, 1]} : vector<64x128xf32> to vector<8x128xf32>
    %cst_47 = arith.constant dense<0.000000e+00> : vector<8x128xf32>
    %189 = tpu.matmul %187, %162, %cst_47 {dimension_numbers = #tpu.dot_dimension_numbers<[1], [0], [0], [1], [0, 0, 1, 1], [], []>} : vector<8x32xf32>, vector<32x128xf32>, vector<8x128xf32> -> vector<8x128xf32>
    %190 = arith.addf %188, %189 : vector<8x128xf32>
    %191 = arith.negf %190 : vector<8x128xf32>
    %192 = math.exp %191 : vector<8x128xf32>
    %cst_48 = arith.constant 1.000000e+00 : f32
    %193 = vector.broadcast %cst_48 : f32 to vector<8x128xf32>
    %194 = arith.addf %193, %192 : vector<8x128xf32>
    %195 = arith.divf %193, %194 : vector<8x128xf32>
    %196 = math.tanh %190 : vector<8x128xf32>
    %197 = vector.extract_strided_slice %195 {offsets = [0, 0], sizes = [8, 32], strides = [1, 1]} : vector<8x128xf32> to vector<8x32xf32>
    %198 = vector.extract_strided_slice %195 {offsets = [0, 32], sizes = [8, 32], strides = [1, 1]} : vector<8x128xf32> to vector<8x32xf32>
    %199 = vector.extract_strided_slice %196 {offsets = [0, 64], sizes = [8, 32], strides = [1, 1]} : vector<8x128xf32> to vector<8x32xf32>
    %200 = vector.extract_strided_slice %195 {offsets = [0, 96], sizes = [8, 32], strides = [1, 1]} : vector<8x128xf32> to vector<8x32xf32>
    %201 = arith.mulf %198, %185 : vector<8x32xf32>
    %202 = arith.mulf %197, %199 : vector<8x32xf32>
    %203 = arith.addf %201, %202 : vector<8x32xf32>
    %204 = math.tanh %203 : vector<8x32xf32>
    %205 = arith.mulf %200, %204 : vector<8x32xf32>
    %206 = vector.extract_strided_slice %167 {offsets = [16, 0], sizes = [8, 128], strides = [1, 1]} : vector<64x128xf32> to vector<8x128xf32>
    %cst_49 = arith.constant dense<0.000000e+00> : vector<8x128xf32>
    %207 = tpu.matmul %205, %162, %cst_49 {dimension_numbers = #tpu.dot_dimension_numbers<[1], [0], [0], [1], [0, 0, 1, 1], [], []>} : vector<8x32xf32>, vector<32x128xf32>, vector<8x128xf32> -> vector<8x128xf32>
    %208 = arith.addf %206, %207 : vector<8x128xf32>
    %209 = arith.negf %208 : vector<8x128xf32>
    %210 = math.exp %209 : vector<8x128xf32>
    %cst_50 = arith.constant 1.000000e+00 : f32
    %211 = vector.broadcast %cst_50 : f32 to vector<8x128xf32>
    %212 = arith.addf %211, %210 : vector<8x128xf32>
    %213 = arith.divf %211, %212 : vector<8x128xf32>
    %214 = math.tanh %208 : vector<8x128xf32>
    %215 = vector.extract_strided_slice %213 {offsets = [0, 0], sizes = [8, 32], strides = [1, 1]} : vector<8x128xf32> to vector<8x32xf32>
    %216 = vector.extract_strided_slice %213 {offsets = [0, 32], sizes = [8, 32], strides = [1, 1]} : vector<8x128xf32> to vector<8x32xf32>
    %217 = vector.extract_strided_slice %214 {offsets = [0, 64], sizes = [8, 32], strides = [1, 1]} : vector<8x128xf32> to vector<8x32xf32>
    %218 = vector.extract_strided_slice %213 {offsets = [0, 96], sizes = [8, 32], strides = [1, 1]} : vector<8x128xf32> to vector<8x32xf32>
    %219 = arith.mulf %216, %203 : vector<8x32xf32>
    %220 = arith.mulf %215, %217 : vector<8x32xf32>
    %221 = arith.addf %219, %220 : vector<8x32xf32>
    %222 = math.tanh %221 : vector<8x32xf32>
    %223 = arith.mulf %218, %222 : vector<8x32xf32>
    %224 = vector.extract_strided_slice %167 {offsets = [24, 0], sizes = [8, 128], strides = [1, 1]} : vector<64x128xf32> to vector<8x128xf32>
    %cst_51 = arith.constant dense<0.000000e+00> : vector<8x128xf32>
    %225 = tpu.matmul %223, %162, %cst_51 {dimension_numbers = #tpu.dot_dimension_numbers<[1], [0], [0], [1], [0, 0, 1, 1], [], []>} : vector<8x32xf32>, vector<32x128xf32>, vector<8x128xf32> -> vector<8x128xf32>
    %226 = arith.addf %224, %225 : vector<8x128xf32>
    %227 = arith.negf %226 : vector<8x128xf32>
    %228 = math.exp %227 : vector<8x128xf32>
    %cst_52 = arith.constant 1.000000e+00 : f32
    %229 = vector.broadcast %cst_52 : f32 to vector<8x128xf32>
    %230 = arith.addf %229, %228 : vector<8x128xf32>
    %231 = arith.divf %229, %230 : vector<8x128xf32>
    %232 = math.tanh %226 : vector<8x128xf32>
    %233 = vector.extract_strided_slice %231 {offsets = [0, 0], sizes = [8, 32], strides = [1, 1]} : vector<8x128xf32> to vector<8x32xf32>
    %234 = vector.extract_strided_slice %231 {offsets = [0, 32], sizes = [8, 32], strides = [1, 1]} : vector<8x128xf32> to vector<8x32xf32>
    %235 = vector.extract_strided_slice %232 {offsets = [0, 64], sizes = [8, 32], strides = [1, 1]} : vector<8x128xf32> to vector<8x32xf32>
    %236 = vector.extract_strided_slice %231 {offsets = [0, 96], sizes = [8, 32], strides = [1, 1]} : vector<8x128xf32> to vector<8x32xf32>
    %237 = arith.mulf %234, %221 : vector<8x32xf32>
    %238 = arith.mulf %233, %235 : vector<8x32xf32>
    %239 = arith.addf %237, %238 : vector<8x32xf32>
    %240 = math.tanh %239 : vector<8x32xf32>
    %241 = arith.mulf %236, %240 : vector<8x32xf32>
    %242 = vector.extract_strided_slice %167 {offsets = [32, 0], sizes = [8, 128], strides = [1, 1]} : vector<64x128xf32> to vector<8x128xf32>
    %cst_53 = arith.constant dense<0.000000e+00> : vector<8x128xf32>
    %243 = tpu.matmul %241, %162, %cst_53 {dimension_numbers = #tpu.dot_dimension_numbers<[1], [0], [0], [1], [0, 0, 1, 1], [], []>} : vector<8x32xf32>, vector<32x128xf32>, vector<8x128xf32> -> vector<8x128xf32>
    %244 = arith.addf %242, %243 : vector<8x128xf32>
    %245 = arith.negf %244 : vector<8x128xf32>
    %246 = math.exp %245 : vector<8x128xf32>
    %cst_54 = arith.constant 1.000000e+00 : f32
    %247 = vector.broadcast %cst_54 : f32 to vector<8x128xf32>
    %248 = arith.addf %247, %246 : vector<8x128xf32>
    %249 = arith.divf %247, %248 : vector<8x128xf32>
    %250 = math.tanh %244 : vector<8x128xf32>
    %251 = vector.extract_strided_slice %249 {offsets = [0, 0], sizes = [8, 32], strides = [1, 1]} : vector<8x128xf32> to vector<8x32xf32>
    %252 = vector.extract_strided_slice %249 {offsets = [0, 32], sizes = [8, 32], strides = [1, 1]} : vector<8x128xf32> to vector<8x32xf32>
    %253 = vector.extract_strided_slice %250 {offsets = [0, 64], sizes = [8, 32], strides = [1, 1]} : vector<8x128xf32> to vector<8x32xf32>
    %254 = vector.extract_strided_slice %249 {offsets = [0, 96], sizes = [8, 32], strides = [1, 1]} : vector<8x128xf32> to vector<8x32xf32>
    %255 = arith.mulf %252, %239 : vector<8x32xf32>
    %256 = arith.mulf %251, %253 : vector<8x32xf32>
    %257 = arith.addf %255, %256 : vector<8x32xf32>
    %258 = math.tanh %257 : vector<8x32xf32>
    %259 = arith.mulf %254, %258 : vector<8x32xf32>
    %260 = vector.extract_strided_slice %167 {offsets = [40, 0], sizes = [8, 128], strides = [1, 1]} : vector<64x128xf32> to vector<8x128xf32>
    %cst_55 = arith.constant dense<0.000000e+00> : vector<8x128xf32>
    %261 = tpu.matmul %259, %162, %cst_55 {dimension_numbers = #tpu.dot_dimension_numbers<[1], [0], [0], [1], [0, 0, 1, 1], [], []>} : vector<8x32xf32>, vector<32x128xf32>, vector<8x128xf32> -> vector<8x128xf32>
    %262 = arith.addf %260, %261 : vector<8x128xf32>
    %263 = arith.negf %262 : vector<8x128xf32>
    %264 = math.exp %263 : vector<8x128xf32>
    %cst_56 = arith.constant 1.000000e+00 : f32
    %265 = vector.broadcast %cst_56 : f32 to vector<8x128xf32>
    %266 = arith.addf %265, %264 : vector<8x128xf32>
    %267 = arith.divf %265, %266 : vector<8x128xf32>
    %268 = math.tanh %262 : vector<8x128xf32>
    %269 = vector.extract_strided_slice %267 {offsets = [0, 0], sizes = [8, 32], strides = [1, 1]} : vector<8x128xf32> to vector<8x32xf32>
    %270 = vector.extract_strided_slice %267 {offsets = [0, 32], sizes = [8, 32], strides = [1, 1]} : vector<8x128xf32> to vector<8x32xf32>
    %271 = vector.extract_strided_slice %268 {offsets = [0, 64], sizes = [8, 32], strides = [1, 1]} : vector<8x128xf32> to vector<8x32xf32>
    %272 = vector.extract_strided_slice %267 {offsets = [0, 96], sizes = [8, 32], strides = [1, 1]} : vector<8x128xf32> to vector<8x32xf32>
    %273 = arith.mulf %270, %257 : vector<8x32xf32>
    %274 = arith.mulf %269, %271 : vector<8x32xf32>
    %275 = arith.addf %273, %274 : vector<8x32xf32>
    %276 = math.tanh %275 : vector<8x32xf32>
    %277 = arith.mulf %272, %276 : vector<8x32xf32>
    %278 = vector.extract_strided_slice %167 {offsets = [48, 0], sizes = [8, 128], strides = [1, 1]} : vector<64x128xf32> to vector<8x128xf32>
    %cst_57 = arith.constant dense<0.000000e+00> : vector<8x128xf32>
    %279 = tpu.matmul %277, %162, %cst_57 {dimension_numbers = #tpu.dot_dimension_numbers<[1], [0], [0], [1], [0, 0, 1, 1], [], []>} : vector<8x32xf32>, vector<32x128xf32>, vector<8x128xf32> -> vector<8x128xf32>
    %280 = arith.addf %278, %279 : vector<8x128xf32>
    %281 = arith.negf %280 : vector<8x128xf32>
    %282 = math.exp %281 : vector<8x128xf32>
    %cst_58 = arith.constant 1.000000e+00 : f32
    %283 = vector.broadcast %cst_58 : f32 to vector<8x128xf32>
    %284 = arith.addf %283, %282 : vector<8x128xf32>
    %285 = arith.divf %283, %284 : vector<8x128xf32>
    %286 = math.tanh %280 : vector<8x128xf32>
    %287 = vector.extract_strided_slice %285 {offsets = [0, 0], sizes = [8, 32], strides = [1, 1]} : vector<8x128xf32> to vector<8x32xf32>
    %288 = vector.extract_strided_slice %285 {offsets = [0, 32], sizes = [8, 32], strides = [1, 1]} : vector<8x128xf32> to vector<8x32xf32>
    %289 = vector.extract_strided_slice %286 {offsets = [0, 64], sizes = [8, 32], strides = [1, 1]} : vector<8x128xf32> to vector<8x32xf32>
    %290 = vector.extract_strided_slice %285 {offsets = [0, 96], sizes = [8, 32], strides = [1, 1]} : vector<8x128xf32> to vector<8x32xf32>
    %291 = arith.mulf %288, %275 : vector<8x32xf32>
    %292 = arith.mulf %287, %289 : vector<8x32xf32>
    %293 = arith.addf %291, %292 : vector<8x32xf32>
    %294 = math.tanh %293 : vector<8x32xf32>
    %295 = arith.mulf %290, %294 : vector<8x32xf32>
    %296 = vector.extract_strided_slice %167 {offsets = [56, 0], sizes = [8, 128], strides = [1, 1]} : vector<64x128xf32> to vector<8x128xf32>
    %cst_59 = arith.constant dense<0.000000e+00> : vector<8x128xf32>
    %297 = tpu.matmul %295, %162, %cst_59 {dimension_numbers = #tpu.dot_dimension_numbers<[1], [0], [0], [1], [0, 0, 1, 1], [], []>} : vector<8x32xf32>, vector<32x128xf32>, vector<8x128xf32> -> vector<8x128xf32>
    %298 = arith.addf %296, %297 : vector<8x128xf32>
    %299 = arith.negf %298 : vector<8x128xf32>
    %300 = math.exp %299 : vector<8x128xf32>
    %cst_60 = arith.constant 1.000000e+00 : f32
    %301 = vector.broadcast %cst_60 : f32 to vector<8x128xf32>
    %302 = arith.addf %301, %300 : vector<8x128xf32>
    %303 = arith.divf %301, %302 : vector<8x128xf32>
    %304 = math.tanh %298 : vector<8x128xf32>
    %305 = vector.extract_strided_slice %303 {offsets = [0, 0], sizes = [8, 32], strides = [1, 1]} : vector<8x128xf32> to vector<8x32xf32>
    %306 = vector.extract_strided_slice %303 {offsets = [0, 32], sizes = [8, 32], strides = [1, 1]} : vector<8x128xf32> to vector<8x32xf32>
    %307 = vector.extract_strided_slice %304 {offsets = [0, 64], sizes = [8, 32], strides = [1, 1]} : vector<8x128xf32> to vector<8x32xf32>
    %308 = vector.extract_strided_slice %303 {offsets = [0, 96], sizes = [8, 32], strides = [1, 1]} : vector<8x128xf32> to vector<8x32xf32>
    %309 = arith.mulf %306, %293 : vector<8x32xf32>
    %310 = arith.mulf %305, %307 : vector<8x32xf32>
    %311 = arith.addf %309, %310 : vector<8x32xf32>
    %312 = math.tanh %311 : vector<8x32xf32>
    %313 = arith.mulf %308, %312 : vector<8x32xf32>
    %c0_61 = arith.constant 0 : index
    %c0_62 = arith.constant 0 : index
    %314 = vector.load %arg7[%c0_61, %c0_62] : memref<32x128xf32, #tpu.memory_space<vmem>>, vector<32x128xf32>
    %cst_63 = arith.constant dense<0.000000e+00> : vector<8x128xf32>
    %315 = tpu.matmul %313, %314, %cst_63 {dimension_numbers = #tpu.dot_dimension_numbers<[1], [0], [0], [1], [0, 0, 1, 1], [], []>} : vector<8x32xf32>, vector<32x128xf32>, vector<8x128xf32> -> vector<8x128xf32>
    %c0_64 = arith.constant 0 : index
    %c0_65 = arith.constant 0 : index
    %316 = vector.load %arg8[%c0_64, %c0_65] : memref<1x128xf32, #tpu.memory_space<vmem>>, vector<1x128xf32>
    %317 = vector.broadcast %316 : vector<1x128xf32> to vector<8x128xf32>
    %318 = arith.addf %315, %317 : vector<8x128xf32>
    %c0_66 = arith.constant 0 : index
    %c0_67 = arith.constant 0 : index
    %319 = vector.load %arg9[%c0_66, %c0_67] : memref<8x128xf32, #tpu.memory_space<vmem>>, vector<8x128xf32>
    tpu.vector_store %arg9[%c0_66, %c0_67], %318 {strides = array<i32>} : memref<8x128xf32, #tpu.memory_space<vmem>>, vector<8x128xf32>,
    return
  }
}

</mosaic_0001>

<bundles_post_ra>
// kernel: lstm_forward.1
= control target key start
LH: loop header
LB: loop body
LE: loop exit
PB: predicated region body
PF: predicated region fallthrough
CT: control target
= control target key end

     0   :  { %vm52_vm0 = vcmask 64512   ;;  %v2658_v0 = vmov 0.0|0.0   ;;  %vm2659_vm1 = vmmov 0   ;;  %v2660_v4 = vmov 0.0   ;;  %s2661_s23 = smov 64   ;;  %s3070_s2 = inlined_call_operand.vmem [shape: f32[32,128], index: 2, kind: input, shape index: {}]   ;;  %s3071_s1 = inlined_call_operand.vmem [shape: f32[8,128], index: 1, kind: input, shape index: {}]   ;;  %s3072_s0 = inlined_call_operand.vmem [shape: f32[64,8], index: 0, kind: input, shape index: {}]   ;;  %s3073_s3 = inlined_call_operand.vmem [shape: f32[1,128], index: 3, kind: input, shape index: {}]   ;;  %s3074_s4 = inlined_call_operand.vmem [shape: f32[32,128], index: 4, kind: input, shape index: {}]   ;;  %s3075_s5 = inlined_call_operand.vmem [shape: f32[32,128], index: 5, kind: input, shape index: {}]   ;;  %s3076_s6 = inlined_call_operand.vmem [shape: f32[1,128], index: 6, kind: input, shape index: {}]   ;;  %s3077_s7 = inlined_call_operand.vmem [shape: f32[32,128], index: 7, kind: input, shape index: {}]   ;;  %s3078_s8 = inlined_call_operand.vmem [shape: f32[1,128], index: 8, kind: input, shape index: {}]   ;;  %s3079_s9 = inlined_call_operand.vmem [shape: f32[8,128], index: 9, kind: output, shape index: {}]  }
   0x1   :  { %2415 = vmatprep.subr.bf16.mxu1 %v2658_v0  ;;  %v33_v1 = vld [vmem:[%s3070_s2] sm:$0xff]  ;;  %v34_v2 = vld [vmem:[%s3070_s2 + $0x8] sm:$0xff]  ;;  %2216 = vmatprep.mubr.msk.f32.mxu1 %vm2659_vm1, %v2660_v4  ;;  %v35_v8 = vld [vmem:[%s3070_s2 + $0x10] sm:$0xff]  ;;  %vm182_vm2 = vcmask 261120  }
   0x2   :  { %v32_v3 = vld [vmem:[%s3071_s1] sm:$0xff]  ;;  %v2725_v5 = vpack.c.bf16 %v34_v2, %v33_v1  ;;  %v39_v7 = vld [vmem:[%s3072_s0 + $0x8] sm:$0xff]  ;;  %v36_v9 = vld [vmem:[%s3070_s2 + $0x18] sm:$0xff] }
   0x3   :  { %2194 = vmatprep.subr.mxu0 %v32_v3  ;;  %v38_v6 = vld [vmem:[%s3072_s0] sm:$0xff]  ;;  %v2742_v10 = vpack.c.bf16 %v36_v9, %v35_v8  ;;  %v40_v46 = vld [vmem:[%s3072_s0 + $0x10] sm:$0xff]  ;;  %v41_v47 = vld [vmem:[%s3072_s0 + $0x18] sm:$0xff] }
   0x4   :  { %2195 = vmatpush3.msra.mxu0 %v32_v3  ;;  %2196 = vmatprep.mubr.msk.f32.mxu0 %vm52_vm0, %v38_v6  ;;  %v2762_v12 = vld [vmem:[%s3073_s3] ss:$0 sm:$0xff]  ;;  %s2662_s3 = smov 32   ;;  %v43_v49 = vld [vmem:[%s3072_s0 + $0x28] sm:$0xff]  ;;  %v44_v50 = vld [vmem:[%s3072_s0 + $0x30] sm:$0xff] }
   0x5   :  { %2417 = vmatpush3.bf16.msra.mxu1 %v2725_v5  ;;  %2197 = vmatmul.mubr.msk.f32.vlgmr.msra.gmra.mrb[0].mxu0 %vm52_vm0, %v39_v7  ;;  %v42_v48 = vld [vmem:[%s3072_s0 + $0x20] sm:$0xff]  ;;  %v45_v51 = vld [vmem:[%s3072_s0 + $0x38] sm:$0xff] }
   0x6   :  { %2418 = vmatprep.subr.bf16.mxu1 %v2658_v0  ;;  %2427 = vmatprep.subr.bf16.mxu0 %v2658_v0 }
   0x7   :  { %2429 = vmatpush3.bf16.msra.mxu0 %v2725_v5  ;;  %2199 = vmatprep.mubr.msk.f32.mxu0 %vm52_vm0, %v40_v46 }
   0x8   :  { %2430 = vmatprep.subr.bf16.mxu0 %v2658_v0 }
   0x9   :  { %2420 = vmatpush3.bf16.msra.mxu1 %v2742_v10  ;;  %2200 = vmatmul.mubr.msk.f32.gmra.mrb[2].mxu0 %vm52_vm0, %v41_v47 }
   0xa   :  { %2421 = vmatprep.subr.bf16.mxu1 %v2658_v0  ;;  %2202 = vmatprep.mubr.msk.f32.mxu0 %vm52_vm0, %v42_v48 }
   0xb   :  { %2432 = vmatpush3.bf16.msra.mxu0 %v2742_v10 }
   0xc   :  { %2217 = vmatmul.mubr.f32.vlgmr.msra.gmra.mrb[0].mxu1 %v2660_v4  ;;  %2439 = vmatprep.subr.bf16.mxu0 %v2658_v0 }
   0xd   :  { %2423 = vmatpush3.bf16.msra.mxu1 %v2725_v5  ;;  %2227 = vmatprep.mubr.msk.f32.mxu1 %vm2659_vm1, %v2660_v4 }
   0xe   :  { %2424 = vmatprep.subr.bf16.mxu1 %v2658_v0  ;;  %2203 = vmatmul.mubr.msk.f32.gmra.mrb[4].mxu0 %vm52_vm0, %v43_v49 }
   0xf   :  { %2205 = vmatprep.mubr.msk.f32.mxu0 %vm52_vm0, %v44_v50 }
  0x11   :  { %2426 = vmatpush3.bf16.msra.mxu1 %v2742_v10 }
  0x12   :  { %2433 = vmatprep.subr.bf16.mxu1 %v2658_v0  ;;  %2206 = vmatmul.mubr.msk.f32.gmra.mrb[6].mxu0 %vm52_vm0, %v45_v51 }
  0x13   :  { %2238 = vmatprep.mubr.msk.f32.mxu0 %vm2659_vm1, %v2660_v4 }
  0xd8   :  { %v2198_v11 = vpop.f32.mrb[0].mxu0 }
  0xd9   :  { %v143_v13 = vpop.f32.mrb[1].mxu0  ;;  %v149_v32 = vadd.f32 %v2198_v11, %v2762_v12 }
  0xda   :  { %v144_v14 = vadd.f32 %v2762_v12, %v143_v13 }
  0xdc   :  { %v2201_v55 = vpop.f32.mrb[2].mxu0 }
  0xdd   :  { %v153_v56 = vpop.f32.mrb[3].mxu0 }
  0xde   :  { %v154_v62 = vadd.f32 %v2762_v12, %v153_v56 }
  0xdf   :  { %v252_v15 = vpop.f32.mrb[0].mxu1 }
  0xe0   :  { %v256_v16 = vadd.f32 %v252_v15, %v144_v14  ;;  %v2218_v17 = vpop.f32.mrb[1].mxu1 }
  0xe1   :  { %v2808_v57 = vpop.f32.mrb[4].mxu0 }
  0xe2   :  { %2530 = vtanh.f32 %v256_v16  ;;  %v2047_v19 = vmul.f32 -1.442695, %v256_v16  ;;  %v2810_v58 = vpop.f32.mrb[5].mxu0 }
  0xe4   :  { %2532 = vpow2.f32 %v2047_v19 }
  0xe5   :  { %v2812_v59 = vpop.f32.mrb[6].mxu0 }
  0xe6   :  { %v2814_v60 = vpop.f32.mrb[7].mxu0 }
  0xec   :  { %v2531_v18 = vpop.eup %2530 }
  0xed   :  { %266 = vrot.lane.b32.xlu0 %v2531_v18, %s2661_s23 }
  0xee   :  { %v2533_v20 = vpop.eup %2532 }
  0xef   :  { %v260_v21 = vadd.f32 1.0, %v2533_v20 }
  0xf1   :  { %2534 = vrcp.f32 %v260_v21  ;;  %v159_v21 = vadd.f32 %v2201_v55, %v2762_v12 }
  0xfb   :  { %v2535_v22 = vpop.eup %2534 }
  0xfc   :  { %v264_v25 = vmul.f32 0.0, %v2535_v22 }
 0x15f   :  { %v267_v23 = vpop.permute.xlu0 %266 }
 0x160   :  { %v269_v24 = vmul.f32 %v2535_v22, %v267_v23 }
 0x162   :  { %271 = vrot.lane.b32.xlu0 %v269_v24, %s2662_s3 }
 0x1d4   :  { %v272_v26 = vpop.permute.xlu0 %271 }
 0x1d5   :  { %v274_v27 = vadd.f32 %v272_v26, %v264_v25 }
 0x1d7   :  { %2536 = vtanh.f32 %v274_v27 }
 0x1e1   :  { %v2537_v28 = vpop.eup %2536 }
 0x1e2   :  { %277 = vrot.lane.b32.xlu1 %v2537_v28, %s2661_s23 }
 0x254   :  { %v278_v29 = vpop.permute.xlu1 %277 }
 0x255   :  { %v280_v30 = vmul.f32 %v2535_v22, %v278_v29 }
 0x257   :  { %282 = vrot.lane.b32.xlu1 %v280_v30, %s2662_s3 }
 0x2c9   :  { %v283_v31 = vpop.permute.xlu1 %282 }
 0x2ca   :  { %285 = vst.msk [vmem:[#allocation2] sm:$0xff] %vm182_vm2, %v283_v31  ;;  %2228 = vmatmul.mubr.msk.f32.vlgmr.msra.gmra.mrb[2].mxu1 %vm182_vm2, %v283_v31 }
 0x2cb   :  { %2435 = vmatpush3.bf16.msra.mxu1 %v2725_v5  ;;  %2249 = vmatprep.mubr.msk.f32.mxu1 %vm2659_vm1, %v2660_v4 }
 0x2cc   :  { %2436 = vmatprep.subr.bf16.mxu1 %v2658_v0 }
 0x2cf   :  { %2438 = vmatpush3.bf16.msra.mxu1 %v2742_v10 }
 0x2d0   :  { %2445 = vmatprep.subr.bf16.mxu1 %v2658_v0 }
 0x39d   :  { %v354_v33 = vpop.f32.mrb[2].mxu1 }
 0x39e   :  { %v358_v34 = vadd.f32 %v354_v33, %v149_v32  ;;  %v2229_v35 = vpop.f32.mrb[3].mxu1 }
 0x3a0   :  { %2538 = vtanh.f32 %v358_v34  ;;  %v2049_v37 = vmul.f32 -1.442695, %v358_v34 }
 0x3a2   :  { %2540 = vpow2.f32 %v2049_v37 }
 0x3aa   :  { %v2539_v36 = vpop.eup %2538 }
 0x3ab   :  { %368 = vrot.lane.b32.xlu0 %v2539_v36, %s2661_s23 }
 0x3ac   :  { %v2541_v38 = vpop.eup %2540 }
 0x3ad   :  { %v362_v39 = vadd.f32 1.0, %v2541_v38 }
 0x3af   :  { %2542 = vrcp.f32 %v362_v39  ;;  %v164_v39 = vadd.f32 %v2762_v12, %v2810_v58  ;;  %v169_v58 = vadd.f32 %v2808_v57, %v2762_v12 }
 0x3b9   :  { %v2543_v40 = vpop.eup %2542 }
 0x3ba   :  { %v366_v43 = vmul.f32 %v2543_v40, %v274_v27 }
 0x41d   :  { %v369_v41 = vpop.permute.xlu0 %368 }
 0x41e   :  { %v371_v42 = vmul.f32 %v2543_v40, %v369_v41 }
 0x420   :  { %373 = vrot.lane.b32.xlu1 %v371_v42, %s2662_s3 }
 0x492   :  { %v374_v44 = vpop.permute.xlu1 %373 }
 0x493   :  { %v376_v45 = vadd.f32 %v374_v44, %v366_v43 }
 0x495   :  { %2544 = vtanh.f32 %v376_v45 }
 0x49f   :  { %v2545_v52 = vpop.eup %2544 }
 0x4a0   :  { %379 = vrot.lane.b32.xlu0 %v2545_v52, %s2661_s23 }
 0x512   :  { %v380_v53 = vpop.permute.xlu0 %379 }
 0x513   :  { %v382_v54 = vmul.f32 %v2543_v40, %v380_v53 }
 0x515   :  { %384 = vrot.lane.b32.xlu1 %v382_v54, %s2662_s3 }
 0x587   :  { %v385_v61 = vpop.permute.xlu1 %384 }
 0x588   :  { %387 = vst.msk [vmem:[#allocation2 + $0x8] sm:$0xff] %vm182_vm2, %v385_v61  ;;  %2239 = vmatmul.mubr.msk.f32.vlgmr.msra.gmra.mrb[8].mxu0 %vm182_vm2, %v385_v61 }
 0x589   :  { %2441 = vmatpush3.bf16.msra.mxu0 %v2725_v5  ;;  %2260 = vmatprep.mubr.msk.f32.mxu0 %vm2659_vm1, %v2660_v4 }
 0x58a   :  { %2442 = vmatprep.subr.bf16.mxu0 %v2658_v0 }
 0x58d   :  { %2444 = vmatpush3.bf16.msra.mxu0 %v2742_v10 }
 0x58e   :  { %2451 = vmatprep.subr.bf16.mxu0 %v2658_v0 }
 0x65b   :  { %v456_v63 = vpop.f32.mrb[8].mxu0 }
 0x65c   :  { %v460_v1 = vadd.f32 %v456_v63, %v154_v62  ;;  %v2240_v2 = vpop.f32.mrb[9].mxu0 }
 0x65e   :  { %2546 = vtanh.f32 %v460_v1  ;;  %v2051_v6 = vmul.f32 -1.442695, %v460_v1 }
 0x660   :  { %2548 = vpow2.f32 %v2051_v6 }
 0x668   :  { %v2547_v3 = vpop.eup %2546 }
 0x669   :  { %470 = vrot.lane.b32.xlu0 %v2547_v3, %s2661_s23 }
 0x66a   :  { %v2549_v7 = vpop.eup %2548 }
 0x66b   :  { %v464_v8 = vadd.f32 1.0, %v2549_v7 }
 0x66d   :  { %2550 = vrcp.f32 %v464_v8 }
 0x677   :  { %v2551_v9 = vpop.eup %2550 }
 0x678   :  { %v468_v14 = vmul.f32 %v2551_v9, %v376_v45 }
 0x6db   :  { %v471_v11 = vpop.permute.xlu0 %470 }
 0x6dc   :  { %v473_v13 = vmul.f32 %v2551_v9, %v471_v11  ;;  %v1000_v11 = vld [vmem:[%s3074_s4] sm:$0xff] }
 0x6de   :  { %475 = vrot.lane.b32.xlu1 %v473_v13, %s2662_s3  ;;  %v1001_v13 = vld [vmem:[%s3074_s4 + $0x8] sm:$0xff] }
 0x750   :  { %v476_v15 = vpop.permute.xlu1 %475 }
 0x751   :  { %v478_v16 = vadd.f32 %v476_v15, %v468_v14  ;;  %v2463_v14 = vpack.c.bf16 %v1001_v13, %v1000_v11 }
 0x753   :  { %2552 = vtanh.f32 %v478_v16 }
 0x75d   :  { %v2553_v17 = vpop.eup %2552 }
 0x75e   :  { %481 = vrot.lane.b32.xlu0 %v2553_v17, %s2661_s23 }
 0x7d0   :  { %v482_v18 = vpop.permute.xlu0 %481 }
 0x7d1   :  { %v484_v19 = vmul.f32 %v2551_v9, %v482_v18  ;;  %v1002_v18 = vld [vmem:[%s3074_s4 + $0x10] sm:$0xff] }
 0x7d3   :  { %486 = vrot.lane.b32.xlu1 %v484_v19, %s2662_s3  ;;  %v1003_v19 = vld [vmem:[%s3074_s4 + $0x18] sm:$0xff] }
 0x845   :  { %v487_v20 = vpop.permute.xlu1 %486 }
 0x846   :  { %489 = vst.msk [vmem:[#allocation2 + $0x10] sm:$0xff] %vm182_vm2, %v487_v20  ;;  %2250 = vmatmul.mubr.msk.f32.vlgmr.msra.gmra.mrb[4].mxu1 %vm182_vm2, %v487_v20  ;;  %v2467_v20 = vpack.c.bf16 %v1003_v19, %v1002_v18 }
 0x847   :  { %2447 = vmatpush3.bf16.msra.mxu1 %v2725_v5  ;;  %2271 = vmatprep.mubr.msk.f32.mxu1 %vm2659_vm1, %v2660_v4 }
 0x848   :  { %2448 = vmatprep.subr.bf16.mxu1 %v2658_v0 }
 0x84b   :  { %2450 = vmatpush3.bf16.msra.mxu1 %v2742_v10 }
 0x84c   :  { %2457 = vmatprep.subr.bf16.mxu1 %v2658_v0 }
 0x919   :  { %v558_v22 = vpop.f32.mrb[4].mxu1 }
 0x91a   :  { %v562_v23 = vadd.f32 %v558_v22, %v159_v21  ;;  %v2251_v24 = vpop.f32.mrb[5].mxu1  ;;  %v1009_v22 = vld [vmem:[#allocation2] sm:$0xff] }
 0x91b   :  { %v1011_v24 = vld [vmem:[#allocation2 + $0x10] sm:$0xff] }
 0x91c   :  { %2554 = vtanh.f32 %v562_v23  ;;  %v2053_v26 = vmul.f32 -1.442695, %v562_v23  ;;  %v1010_v23 = vld [vmem:[#allocation2 + $0x8] sm:$0xff] }
 0x91e   :  { %2556 = vpow2.f32 %v2053_v26 }
 0x926   :  { %v2555_v25 = vpop.eup %2554 }
 0x927   :  { %572 = vrot.lane.b32.xlu0 %v2555_v25, %s2661_s23 }
 0x928   :  { %v2557_v27 = vpop.eup %2556 }
 0x929   :  { %v566_v28 = vadd.f32 1.0, %v2557_v27 }
 0x92b   :  { %2558 = vrcp.f32 %v566_v28  ;;  %v174_v28 = vadd.f32 %v2762_v12, %v2814_v60 }
 0x935   :  { %v2559_v29 = vpop.eup %2558 }
 0x936   :  { %v570_v32 = vmul.f32 %v2559_v29, %v478_v16 }
 0x999   :  { %v573_v30 = vpop.permute.xlu0 %572 }
 0x99a   :  { %v575_v31 = vmul.f32 %v2559_v29, %v573_v30 }
 0x99c   :  { %577 = vrot.lane.b32.xlu1 %v575_v31, %s2662_s3 }
 0xa0e   :  { %v578_v33 = vpop.permute.xlu1 %577 }
 0xa0f   :  { %v580_v34 = vadd.f32 %v578_v33, %v570_v32 }
 0xa11   :  { %2560 = vtanh.f32 %v580_v34 }
 0xa1b   :  { %v2561_v35 = vpop.eup %2560 }
 0xa1c   :  { %583 = vrot.lane.b32.xlu0 %v2561_v35, %s2661_s23 }
 0xa8e   :  { %v584_v36 = vpop.permute.xlu0 %583 }
 0xa8f   :  { %v586_v37 = vmul.f32 %v2559_v29, %v584_v36 }
 0xa91   :  { %588 = vrot.lane.b32.xlu1 %v586_v37, %s2662_s3 }
 0xb03   :  { %v589_v38 = vpop.permute.xlu1 %588 }
 0xb04   :  { %591 = vst.msk [vmem:[#allocation2 + $0x18] sm:$0xff] %vm182_vm2, %v589_v38  ;;  %2261 = vmatmul.mubr.msk.f32.vlgmr.msra.gmra.mrb[10].mxu0 %vm182_vm2, %v589_v38 }
 0xb05   :  { %2453 = vmatpush3.bf16.msra.mxu0 %v2725_v5  ;;  %2282 = vmatprep.mubr.msk.f32.mxu0 %vm2659_vm1, %v2660_v4 }
 0xb06   :  { %2454 = vmatprep.subr.bf16.mxu0 %v2658_v0 }
 0xb09   :  { %2456 = vmatpush3.bf16.msra.mxu0 %v2742_v10 }
 0xb0a   :  { %2464 = vmatprep.subr.bf16.mxu0 %v2463_v14 }
 0xb0b   :  { %v1012_v25 = vld [vmem:[#allocation2 + $0x18] sm:$0xff] }
 0xbd7   :  { %v660_v40 = vpop.f32.mrb[10].mxu0 }
 0xbd8   :  { %v664_v41 = vadd.f32 %v660_v40, %v164_v39  ;;  %v2262_v42 = vpop.f32.mrb[11].mxu0 }
 0xbda   :  { %2562 = vtanh.f32 %v664_v41  ;;  %v2055_v44 = vmul.f32 -1.442695, %v664_v41 }
 0xbdc   :  { %2564 = vpow2.f32 %v2055_v44 }
 0xbe4   :  { %v2563_v43 = vpop.eup %2562 }
 0xbe5   :  { %674 = vrot.lane.b32.xlu0 %v2563_v43, %s2661_s23 }
 0xbe6   :  { %v2565_v45 = vpop.eup %2564 }
 0xbe7   :  { %v668_v46 = vadd.f32 1.0, %v2565_v45 }
 0xbe9   :  { %2566 = vrcp.f32 %v668_v46 }
 0xbf3   :  { %v2567_v47 = vpop.eup %2566 }
 0xbf4   :  { %v672_v50 = vmul.f32 %v2567_v47, %v580_v34 }
 0xc57   :  { %v675_v48 = vpop.permute.xlu0 %674 }
 0xc58   :  { %v677_v49 = vmul.f32 %v2567_v47, %v675_v48  ;;  %v1004_v48 = vld [vmem:[%s3075_s5] sm:$0xff] }
 0xc5a   :  { %679 = vrot.lane.b32.xlu1 %v677_v49, %s2662_s3  ;;  %v1005_v49 = vld [vmem:[%s3075_s5 + $0x8] sm:$0xff] }
 0xccc   :  { %v680_v51 = vpop.permute.xlu1 %679 }
 0xccd   :  { %v682_v52 = vadd.f32 %v680_v51, %v672_v50  ;;  %v2914_v50 = vpack.c.bf16 %v1005_v49, %v1004_v48  ;;  %v1006_v51 = vld [vmem:[%s3075_s5 + $0x10] sm:$0xff] }
 0xccf   :  { %2568 = vtanh.f32 %v682_v52 }
 0xcd9   :  { %v2569_v53 = vpop.eup %2568 }
 0xcda   :  { %685 = vrot.lane.b32.xlu0 %v2569_v53, %s2661_s23 }
 0xd4c   :  { %v686_v54 = vpop.permute.xlu0 %685 }
 0xd4d   :  { %v688_v55 = vmul.f32 %v2567_v47, %v686_v54 }
 0xd4f   :  { %690 = vrot.lane.b32.xlu1 %v688_v55, %s2662_s3 }
 0xdc1   :  { %v691_v56 = vpop.permute.xlu1 %690 }
 0xdc2   :  { %693 = vst.msk [vmem:[#allocation2 + $0x20] sm:$0xff] %vm182_vm2, %v691_v56  ;;  %2272 = vmatmul.mubr.msk.f32.vlgmr.msra.gmra.mrb[6].mxu1 %vm182_vm2, %v691_v56 }
 0xdc3   :  { %2459 = vmatpush3.bf16.msra.mxu1 %v2725_v5  ;;  %2293 = vmatprep.mubr.msk.f32.mxu1 %vm2659_vm1, %v2660_v4 }
 0xdc4   :  { %2460 = vmatprep.subr.bf16.mxu1 %v2658_v0 }
 0xdc7   :  { %2462 = vmatpush3.bf16.msra.mxu1 %v2742_v10 }
 0xdc8   :  { %2471 = vmatprep.subr.bf16.mxu1 %v2658_v0 }
 0xdc9   :  { %v1013_v26 = vld [vmem:[#allocation2 + $0x20] sm:$0xff] }
 0xe95   :  { %v762_v61 = vpop.f32.mrb[6].mxu1 }
 0xe96   :  { %v766_v62 = vadd.f32 %v762_v61, %v169_v58  ;;  %v2273_v63 = vpop.f32.mrb[7].mxu1  ;;  %v179_v61 = vadd.f32 %v2812_v59, %v2762_v12 }
 0xe98   :  { %2570 = vtanh.f32 %v766_v62  ;;  %v2057_v5 = vmul.f32 -1.442695, %v766_v62 }
 0xe9a   :  { %2572 = vpow2.f32 %v2057_v5  ;;  %v2950_v5 = vld [vmem:[%s3076_s6] ss:$0 sm:$0xff] }
 0xea2   :  { %v2571_v1 = vpop.eup %2570 }
 0xea3   :  { %776 = vrot.lane.b32.xlu0 %v2571_v1, %s2661_s23 }
 0xea4   :  { %v2573_v2 = vpop.eup %2572 }
 0xea5   :  { %v770_v3 = vadd.f32 1.0, %v2573_v2 }
 0xea7   :  { %2574 = vrcp.f32 %v770_v3 }
 0xeb1   :  { %v2575_v6 = vpop.eup %2574 }
 0xeb2   :  { %v774_v8 = vmul.f32 %v2575_v6, %v682_v52  ;;  %v1007_v52 = vld [vmem:[%s3075_s5 + $0x18] sm:$0xff] }
 0xeb3   :  { %v2924_v53 = vpack.c.bf16 %v1007_v52, %v1006_v51 }
 0xf15   :  { %v777_v7 = vpop.permute.xlu0 %776 }
 0xf16   :  { %v779_v10 = vmul.f32 %v2575_v6, %v777_v7 }
 0xf18   :  { %781 = vrot.lane.b32.xlu1 %v779_v10, %s2662_s3 }
 0xf8a   :  { %v782_v9 = vpop.permute.xlu1 %781 }
 0xf8b   :  { %v784_v57 = vadd.f32 %v782_v9, %v774_v8 }
 0xf8d   :  { %2576 = vtanh.f32 %v784_v57 }
 0xf97   :  { %v2577_v15 = vpop.eup %2576 }
 0xf98   :  { %787 = vrot.lane.b32.xlu0 %v2577_v15, %s2661_s23 }
0x100a   :  { %v788_v16 = vpop.permute.xlu0 %787 }
0x100b   :  { %v790_v17 = vmul.f32 %v2575_v6, %v788_v16 }
0x100d   :  { %792 = vrot.lane.b32.xlu1 %v790_v17, %s2662_s3 }
0x107f   :  { %v793_v21 = vpop.permute.xlu1 %792 }
0x1080   :  { %795 = vst.msk [vmem:[#allocation2 + $0x28] sm:$0xff] %vm182_vm2, %v793_v21  ;;  %2283 = vmatmul.mubr.msk.f32.vlgmr.msra.gmra.mrb[12].mxu0 %vm182_vm2, %v793_v21 }
0x1081   :  { %2466 = vmatpush3.bf16.msra.mxu0 %v2463_v14  ;;  %2304 = vmatprep.mubr.msk.f32.mxu0 %vm182_vm2, %v1009_v22 }
0x1082   :  { %2468 = vmatprep.subr.bf16.mxu0 %v2467_v20 }
0x1085   :  { %2470 = vmatpush3.bf16.msra.mxu0 %v2467_v20 }
0x1086   :  { %2483 = vmatprep.subr.bf16.mxu0 %v2658_v0 }
0x1087   :  { %v1014_v27 = vld [vmem:[#allocation2 + $0x28] sm:$0xff] }
0x1088   :  { %2305 = vmatmul.mubr.msk.f32.vlgmr.msra.gmra.mrb[14].mxu0 %vm182_vm2, %v1010_v23 }
0x1089   :  { %2307 = vmatprep.mubr.msk.f32.mxu0 %vm182_vm2, %v1011_v24  ;;  %2485 = vmatpush3.bf16.msra.mxu0 %v2914_v50 }
0x108a   :  { %2486 = vmatprep.subr.bf16.mxu0 %v2658_v0 }
0x108c   :  { %2308 = vmatmul.mubr.msk.f32.gmra.mrb[16].mxu0 %vm182_vm2, %v1012_v25 }
0x108d   :  { %2310 = vmatprep.mubr.msk.f32.mxu0 %vm182_vm2, %v1013_v26  ;;  %2488 = vmatpush3.bf16.msra.mxu0 %v2924_v53 }
0x108e   :  { %2495 = vmatprep.subr.bf16.mxu0 %v2658_v0 }
0x1090   :  { %2311 = vmatmul.mubr.msk.f32.gmra.mrb[18].mxu0 %vm182_vm2, %v1014_v27 }
0x1153   :  { %v864_v29 = vpop.f32.mrb[12].mxu0 }
0x1154   :  { %v868_v30 = vadd.f32 %v864_v29, %v174_v28  ;;  %v2284_v31 = vpop.f32.mrb[13].mxu0 }
0x1156   :  { %2578 = vtanh.f32 %v868_v30  ;;  %v2059_v39 = vmul.f32 -1.442695, %v868_v30 }
0x1158   :  { %2580 = vpow2.f32 %v2059_v39 }
0x115b   :  { %v2892_v32 = vpop.f32.mrb[14].mxu0 }
0x115c   :  { %v1113_v33 = vpop.f32.mrb[15].mxu0 }
0x115d   :  { %v1114_v2 = vadd.f32 %v2950_v5, %v1113_v33 }
0x115f   :  { %v2894_v34 = vpop.f32.mrb[16].mxu0 }
0x1160   :  { %v2579_v35 = vpop.eup %2578  ;;  %v2896_v36 = vpop.f32.mrb[17].mxu0 }
0x1161   :  { %878 = vrot.lane.b32.xlu0 %v2579_v35, %s2661_s23  ;;  %v1119_v35 = vadd.f32 %v2892_v32, %v2950_v5 }
0x1162   :  { %v2581_v60 = vpop.eup %2580 }
0x1163   :  { %v2899_v37 = vpop.f32.mrb[18].mxu0  ;;  %v872_v40 = vadd.f32 1.0, %v2581_v60 }
0x1164   :  { %v2901_v38 = vpop.f32.mrb[19].mxu0 }
0x1165   :  { %2582 = vrcp.f32 %v872_v40 }
0x116f   :  { %v2583_v41 = vpop.eup %2582 }
0x1170   :  { %v876_v44 = vmul.f32 %v2583_v41, %v784_v57 }
0x11d3   :  { %v879_v42 = vpop.permute.xlu0 %878 }
0x11d4   :  { %v881_v43 = vmul.f32 %v2583_v41, %v879_v42 }
0x11d6   :  { %883 = vrot.lane.b32.xlu1 %v881_v43, %s2662_s3 }
0x1248   :  { %v884_v45 = vpop.permute.xlu1 %883 }
0x1249   :  { %v2904_v46 = vadd.f32 %v884_v45, %v876_v44 }
0x124b   :  { %2584 = vtanh.f32 %v2904_v46 }
0x1255   :  { %v2585_v47 = vpop.eup %2584 }
0x1256   :  { %889 = vrot.lane.b32.xlu0 %v2585_v47, %s2661_s23 }
0x12c8   :  { %v890_v54 = vpop.permute.xlu0 %889 }
0x12c9   :  { %v892_v55 = vmul.f32 %v2583_v41, %v890_v54 }
0x12cb   :  { %894 = vrot.lane.b32.xlu1 %v892_v55, %s2662_s3 }
0x133d   :  { %v895_v56 = vpop.permute.xlu1 %894 }
0x133e   :  { %897 = vst.msk [vmem:[#allocation2 + $0x30] sm:$0xff] %vm182_vm2, %v895_v56  ;;  %2294 = vmatmul.mubr.msk.f32.vlgmr.msra.gmra.mrb[8].mxu1 %vm182_vm2, %v895_v56 }
0x133f   :  { %2473 = vmatpush3.bf16.msra.mxu1 %v2914_v50  ;;  %2324 = vmatprep.mubr.msk.f32.mxu1 %vm2659_vm1, %v2660_v4 }
0x1340   :  { %2474 = vmatprep.subr.bf16.mxu1 %v2658_v0 }
0x1343   :  { %2476 = vmatpush3.bf16.msra.mxu1 %v2924_v53 }
0x1344   :  { %2477 = vmatprep.subr.bf16.mxu1 %v2658_v0 }
0x1345   :  { %v1015_v58 = vld [vmem:[#allocation2 + $0x30] sm:$0xff] }
0x1346   :  { %2325 = vmatmul.mubr.f32.vlgmr.msra.gmra.mrb[10].mxu1 %v2660_v4  ;;  %2313 = vmatprep.mubr.msk.f32.mxu0 %vm182_vm2, %v1015_v58 }
0x1347   :  { %2479 = vmatpush3.bf16.msra.mxu1 %v2914_v50  ;;  %2335 = vmatprep.mubr.msk.f32.mxu1 %vm2659_vm1, %v2660_v4 }
0x1348   :  { %2480 = vmatprep.subr.bf16.mxu1 %v2658_v0 }
0x134b   :  { %2482 = vmatpush3.bf16.msra.mxu1 %v2924_v53 }
0x134c   :  { %2489 = vmatprep.subr.bf16.mxu1 %v2658_v0 }
0x1411   :  { %v966_v62 = vpop.f32.mrb[8].mxu1 }
0x1412   :  { %v970_v63 = vadd.f32 %v966_v62, %v179_v61  ;;  %v2295_v1 = vpop.f32.mrb[9].mxu1 }
0x1414   :  { %v2061_v18 = vmul.f32 -1.442695, %v970_v63 }
0x1419   :  { %v1218_v3 = vpop.f32.mrb[10].mxu1 }
0x141a   :  { %v1222_v6 = vadd.f32 %v1218_v3, %v1114_v2  ;;  %v2326_v7 = vpop.f32.mrb[11].mxu1 }
0x141c   :  { %2586 = vtanh.f32 %v1222_v6  ;;  %v2071_v8 = vmul.f32 -1.442695, %v1222_v6 }
0x141e   :  { %2588 = vpow2.f32 %v2071_v8 }
0x1426   :  { %v2587_v10 = vpop.eup %2586 }
0x1427   :  { %1232 = vrot.lane.b32.xlu0 %v2587_v10, %s2661_s23 }
0x1428   :  { %v2589_v12 = vpop.eup %2588 }
0x1429   :  { %v1226_v59 = vadd.f32 1.0, %v2589_v12 }
0x142b   :  { %2590 = vrcp.f32 %v1226_v59 }
0x1435   :  { %v2591_v9 = vpop.eup %2590 }
0x1436   :  { %v1230_v13 = vmul.f32 0.0, %v2591_v9 }
0x1499   :  { %v1233_v57 = vpop.permute.xlu0 %1232 }
0x149a   :  { %v1235_v11 = vmul.f32 %v2591_v9, %v1233_v57 }
0x149c   :  { %1237 = vrot.lane.b32.xlu1 %v1235_v11, %s2662_s3 }
0x150e   :  { %v1238_v14 = vpop.permute.xlu1 %1237 }
0x150f   :  { %v1240_v15 = vadd.f32 %v1238_v14, %v1230_v13 }
0x1511   :  { %2592 = vtanh.f32 %v1240_v15 }
0x1512   :  { %2594 = vtanh.f32 %v970_v63  ;;  %v1124_v63 = vadd.f32 %v2950_v5, %v2896_v36 }
0x1513   :  { %2596 = vpow2.f32 %v2061_v18 }
0x151b   :  { %v2593_v16 = vpop.eup %2592 }
0x151c   :  { %1243 = vrot.lane.b32.xlu0 %v2593_v16, %s2661_s23  ;;  %v2595_v17 = vpop.eup %2594 }
0x151d   :  { %v2597_v19 = vpop.eup %2596 }
0x151e   :  { %v974_v20 = vadd.f32 1.0, %v2597_v19 }
0x1520   :  { %980 = vrot.lane.b32.xlu0 %v2595_v17, %s2661_s23  ;;  %2598 = vrcp.f32 %v974_v20  ;;  %v1129_v17 = vadd.f32 %v2894_v34, %v2950_v5 }
0x152a   :  { %v2599_v23 = vpop.eup %2598 }
0x152b   :  { %v978_v27 = vmul.f32 %v2599_v23, %v2904_v46 }
0x158e   :  { %v1244_v21 = vpop.permute.xlu0 %1243 }
0x158f   :  { %v1246_v22 = vmul.f32 %v2591_v9, %v1244_v21 }
0x1591   :  { %1248 = vrot.lane.b32.xlu1 %v1246_v22, %s2662_s3 }
0x1592   :  { %v981_v24 = vpop.permute.xlu0 %980 }
0x1593   :  { %v983_v25 = vmul.f32 %v2599_v23, %v981_v24 }
0x1595   :  { %985 = vrot.lane.b32.xlu0 %v983_v25, %s2662_s3 }
0x1603   :  { %v1249_v26 = vpop.permute.xlu1 %1248 }
0x1604   :  { %2336 = vmatmul.mubr.msk.f32.vlgmr.msra.gmra.mrb[12].mxu1 %vm182_vm2, %v1249_v26 }
0x1605   :  { %2491 = vmatpush3.bf16.msra.mxu1 %v2914_v50  ;;  %2357 = vmatprep.mubr.msk.f32.mxu1 %vm2659_vm1, %v2660_v4 }
0x1606   :  { %2492 = vmatprep.subr.bf16.mxu1 %v2658_v0 }
0x1607   :  { %v986_v28 = vpop.permute.xlu0 %985 }
0x1608   :  { %v988_v29 = vadd.f32 %v986_v28, %v978_v27 }
0x1609   :  { %2494 = vmatpush3.bf16.msra.mxu1 %v2924_v53 }
0x160a   :  { %2600 = vtanh.f32 %v988_v29  ;;  %2501 = vmatprep.subr.bf16.mxu1 %v2658_v0 }
0x1614   :  { %v2601_v30 = vpop.eup %2600 }
0x1615   :  { %991 = vrot.lane.b32.xlu0 %v2601_v30, %s2661_s23 }
0x1687   :  { %v992_v31 = vpop.permute.xlu0 %991 }
0x1688   :  { %v994_v33 = vmul.f32 %v2599_v23, %v992_v31 }
0x168a   :  { %996 = vrot.lane.b32.xlu0 %v994_v33, %s2662_s3 }
0x16d7   :  { %v1318_v39 = vpop.f32.mrb[12].mxu1 }
0x16d8   :  { %v1322_v60 = vadd.f32 %v1318_v39, %v1119_v35  ;;  %v2337_v40 = vpop.f32.mrb[13].mxu1  ;;  %v1134_v39 = vadd.f32 %v2950_v5, %v2901_v38 }
0x16da   :  { %2602 = vtanh.f32 %v1322_v60  ;;  %v2073_v44 = vmul.f32 -1.442695, %v1322_v60 }
0x16dc   :  { %2604 = vpow2.f32 %v2073_v44 }
0x16e4   :  { %v2603_v41 = vpop.eup %2602 }
0x16e5   :  { %1332 = vrot.lane.b32.xlu1 %v2603_v41, %s2661_s23 }
0x16e6   :  { %v2605_v45 = vpop.eup %2604 }
0x16e7   :  { %v1326_v32 = vadd.f32 1.0, %v2605_v45 }
0x16e9   :  { %2606 = vrcp.f32 %v1326_v32 }
0x16f3   :  { %v2607_v46 = vpop.eup %2606 }
0x16f4   :  { %v1330_v49 = vmul.f32 %v2607_v46, %v1240_v15 }
0x16fc   :  { %v997_v42 = vpop.permute.xlu0 %996 }
0x16fd   :  { %999 = vst.msk [vmem:[#allocation2 + $0x38] sm:$0xff] %vm182_vm2, %v997_v42 }
0x1704   :  { %v1016_v43 = vld [vmem:[#allocation2 + $0x38] sm:$0xff] }
0x1705   :  { %2314 = vmatmul.mubr.msk.f32.gmra.mrb[20].mxu0 %vm182_vm2, %v1016_v43 }
0x1706   :  { %2346 = vmatprep.mubr.msk.f32.mxu0 %vm2659_vm1, %v2660_v4 }
0x1757   :  { %v1333_v47 = vpop.permute.xlu1 %1332 }
0x1758   :  { %v1335_v48 = vmul.f32 %v2607_v46, %v1333_v47 }
0x175a   :  { %1337 = vrot.lane.b32.xlu1 %v1335_v48, %s2662_s3 }
0x17cc   :  { %v1338_v51 = vpop.permute.xlu1 %1337 }
0x17cd   :  { %v1340_v52 = vadd.f32 %v1338_v51, %v1330_v49 }
0x17cf   :  { %2608 = vtanh.f32 %v1340_v52 }
0x17d8   :  { %v2977_v54 = vpop.f32.mrb[20].mxu0 }
0x17d9   :  { %v2609_v55 = vpop.eup %2608  ;;  %v2979_v56 = vpop.f32.mrb[21].mxu0 }
0x17da   :  { %1343 = vrot.lane.b32.xlu1 %v2609_v55, %s2661_s23 }
0x184c   :  { %v1344_v58 = vpop.permute.xlu1 %1343 }
0x184d   :  { %v1346_v61 = vmul.f32 %v2607_v46, %v1344_v58 }
0x184f   :  { %1348 = vrot.lane.b32.xlu1 %v1346_v61, %s2662_s3  ;;  %v1139_v61 = vadd.f32 %v2899_v37, %v2950_v5 }
0x18c1   :  { %v1349_v62 = vpop.permute.xlu1 %1348 }
0x18c2   :  { %2347 = vmatmul.mubr.msk.f32.vlgmr.msra.gmra.mrb[22].mxu0 %vm182_vm2, %v1349_v62 }
0x18c3   :  { %2497 = vmatpush3.bf16.msra.mxu0 %v2914_v50  ;;  %2368 = vmatprep.mubr.msk.f32.mxu0 %vm2659_vm1, %v2660_v4 }
0x18c4   :  { %2498 = vmatprep.subr.bf16.mxu0 %v2658_v0 }
0x18c7   :  { %2500 = vmatpush3.bf16.msra.mxu0 %v2924_v53 }
0x18c8   :  { %2507 = vmatprep.subr.bf16.mxu0 %v2658_v0 }
0x1995   :  { %v1418_v1 = vpop.f32.mrb[22].mxu0 }
0x1996   :  { %v1422_v2 = vadd.f32 %v1418_v1, %v1124_v63  ;;  %v2348_v3 = vpop.f32.mrb[23].mxu0 }
0x1998   :  { %2610 = vtanh.f32 %v1422_v2  ;;  %v2075_v7 = vmul.f32 -1.442695, %v1422_v2 }
0x199a   :  { %2612 = vpow2.f32 %v2075_v7 }
0x19a2   :  { %v2611_v6 = vpop.eup %2610 }
0x19a3   :  { %1432 = vrot.lane.b32.xlu0 %v2611_v6, %s2661_s23 }
0x19a4   :  { %v2613_v10 = vpop.eup %2612 }
0x19a5   :  { %v1426_v8 = vadd.f32 1.0, %v2613_v10 }
0x19a7   :  { %2614 = vrcp.f32 %v1426_v8 }
0x19b1   :  { %v2615_v12 = vpop.eup %2614 }
0x19b2   :  { %v1430_v57 = vmul.f32 %v2615_v12, %v1340_v52 }
0x1a15   :  { %v1433_v59 = vpop.permute.xlu0 %1432 }
0x1a16   :  { %v1435_v9 = vmul.f32 %v2615_v12, %v1433_v59 }
0x1a18   :  { %1437 = vrot.lane.b32.xlu1 %v1435_v9, %s2662_s3 }
0x1a8a   :  { %v1438_v11 = vpop.permute.xlu1 %1437 }
0x1a8b   :  { %v1440_v36 = vadd.f32 %v1438_v11, %v1430_v57 }
0x1a8d   :  { %2616 = vtanh.f32 %v1440_v36 }
0x1a97   :  { %v2617_v13 = vpop.eup %2616 }
0x1a98   :  { %1443 = vrot.lane.b32.xlu0 %v2617_v13, %s2661_s23 }
0x1b0a   :  { %v1444_v14 = vpop.permute.xlu0 %1443 }
0x1b0b   :  { %v1446_v15 = vmul.f32 %v2615_v12, %v1444_v14 }
0x1b0d   :  { %1448 = vrot.lane.b32.xlu1 %v1446_v15, %s2662_s3 }
0x1b7f   :  { %v1449_v16 = vpop.permute.xlu1 %1448 }
0x1b80   :  { %2358 = vmatmul.mubr.msk.f32.vlgmr.msra.gmra.mrb[14].mxu1 %vm182_vm2, %v1449_v16 }
0x1b81   :  { %2503 = vmatpush3.bf16.msra.mxu1 %v2914_v50  ;;  %2379 = vmatprep.mubr.msk.f32.mxu1 %vm2659_vm1, %v2660_v4 }
0x1b82   :  { %2504 = vmatprep.subr.bf16.mxu1 %v2658_v0 }
0x1b85   :  { %2506 = vmatpush3.bf16.msra.mxu1 %v2924_v53 }
0x1b86   :  { %2513 = vmatprep.subr.bf16.mxu1 %v2658_v0 }
0x1c53   :  { %v1518_v18 = vpop.f32.mrb[14].mxu1 }
0x1c54   :  { %v1522_v19 = vadd.f32 %v1518_v18, %v1129_v17  ;;  %v2359_v20 = vpop.f32.mrb[15].mxu1 }
0x1c56   :  { %2618 = vtanh.f32 %v1522_v19  ;;  %v2077_v22 = vmul.f32 -1.442695, %v1522_v19 }
0x1c58   :  { %2620 = vpow2.f32 %v2077_v22 }
0x1c60   :  { %v2619_v21 = vpop.eup %2618 }
0x1c61   :  { %1532 = vrot.lane.b32.xlu0 %v2619_v21, %s2661_s23 }
0x1c62   :  { %v2621_v23 = vpop.eup %2620 }
0x1c63   :  { %v1526_v24 = vadd.f32 1.0, %v2621_v23 }
0x1c65   :  { %2622 = vrcp.f32 %v1526_v24 }
0x1c6f   :  { %v2623_v25 = vpop.eup %2622 }
0x1c70   :  { %v1530_v28 = vmul.f32 %v2623_v25, %v1440_v36  ;;  %v1144_v36 = vadd.f32 %v2950_v5, %v2979_v56 }
0x1cd3   :  { %v1533_v26 = vpop.permute.xlu0 %1532 }
0x1cd4   :  { %v1535_v27 = vmul.f32 %v2623_v25, %v1533_v26 }
0x1cd6   :  { %1537 = vrot.lane.b32.xlu1 %v1535_v27, %s2662_s3 }
0x1d48   :  { %v1538_v29 = vpop.permute.xlu1 %1537 }
0x1d49   :  { %v1540_v34 = vadd.f32 %v1538_v29, %v1530_v28  ;;  %v1149_v28 = vadd.f32 %v2977_v54, %v2950_v5  ;;  %v1947_v54 = vld [vmem:[%s3077_s7] sm:$0xff] }
0x1d4b   :  { %2624 = vtanh.f32 %v1540_v34 }
0x1d55   :  { %v2625_v30 = vpop.eup %2624 }
0x1d56   :  { %1543 = vrot.lane.b32.xlu0 %v2625_v30, %s2661_s23 }
0x1dc8   :  { %v1544_v31 = vpop.permute.xlu0 %1543 }
0x1dc9   :  { %v1546_v33 = vmul.f32 %v2623_v25, %v1544_v31 }
0x1dcb   :  { %1548 = vrot.lane.b32.xlu1 %v1546_v33, %s2662_s3 }
0x1e3d   :  { %v1549_v35 = vpop.permute.xlu1 %1548 }
0x1e3e   :  { %2369 = vmatmul.mubr.msk.f32.vlgmr.msra.gmra.mrb[24].mxu0 %vm182_vm2, %v1549_v35 }
0x1e3f   :  { %2509 = vmatpush3.bf16.msra.mxu0 %v2914_v50  ;;  %2390 = vmatprep.mubr.msk.f32.mxu0 %vm2659_vm1, %v2660_v4 }
0x1e40   :  { %2510 = vmatprep.subr.bf16.mxu0 %v2658_v0 }
0x1e43   :  { %2512 = vmatpush3.bf16.msra.mxu0 %v2924_v53 }
0x1e44   :  { %2519 = vmatprep.subr.bf16.mxu0 %v2658_v0 }
0x1f11   :  { %v1618_v60 = vpop.f32.mrb[24].mxu0 }
0x1f12   :  { %v1622_v40 = vadd.f32 %v1618_v60, %v1134_v39  ;;  %v2370_v41 = vpop.f32.mrb[25].mxu0 }
0x1f14   :  { %2626 = vtanh.f32 %v1622_v40  ;;  %v2079_v43 = vmul.f32 -1.442695, %v1622_v40 }
0x1f16   :  { %2628 = vpow2.f32 %v2079_v43 }
0x1f1e   :  { %v2627_v42 = vpop.eup %2626 }
0x1f1f   :  { %1632 = vrot.lane.b32.xlu0 %v2627_v42, %s2661_s23 }
0x1f20   :  { %v2629_v44 = vpop.eup %2628 }
0x1f21   :  { %v1626_v45 = vadd.f32 1.0, %v2629_v44  ;;  %v1948_v44 = vld [vmem:[%s3077_s7 + $0x8] sm:$0xff] }
0x1f23   :  { %2630 = vrcp.f32 %v1626_v45  ;;  %v1949_v45 = vld [vmem:[%s3077_s7 + $0x10] sm:$0xff] }
0x1f2d   :  { %v2631_v32 = vpop.eup %2630 }
0x1f2e   :  { %v1630_v48 = vmul.f32 %v2631_v32, %v1540_v34 }
0x1f91   :  { %v1633_v46 = vpop.permute.xlu0 %1632 }
0x1f92   :  { %v1635_v47 = vmul.f32 %v2631_v32, %v1633_v46  ;;  %v1950_v46 = vld [vmem:[%s3077_s7 + $0x18] sm:$0xff] }
0x1f94   :  { %1637 = vrot.lane.b32.xlu1 %v1635_v47, %s2662_s3  ;;  %v2523_v47 = vpack.c.bf16 %v1950_v46, %v1949_v45 }
0x2006   :  { %v1638_v49 = vpop.permute.xlu1 %1637 }
0x2007   :  { %v1640_v38 = vadd.f32 %v1638_v49, %v1630_v48 }
0x2009   :  { %2632 = vtanh.f32 %v1640_v38 }
0x2013   :  { %v2633_v51 = vpop.eup %2632 }
0x2014   :  { %1643 = vrot.lane.b32.xlu0 %v2633_v51, %s2661_s23 }
0x2086   :  { %v1644_v52 = vpop.permute.xlu0 %1643 }
0x2087   :  { %v1646_v55 = vmul.f32 %v2631_v32, %v1644_v52  ;;  %v2520_v32 = vpack.c.bf16 %v1948_v44, %v1947_v54  ;;  %v2086_v52 = vld [vmem:[%s3078_s8] ss:$0 sm:$0xff] }
0x2089   :  { %1648 = vrot.lane.b32.xlu1 %v1646_v55, %s2662_s3 }
0x20fb   :  { %v1649_v58 = vpop.permute.xlu1 %1648 }
0x20fc   :  { %2380 = vmatmul.mubr.msk.f32.vlgmr.msra.gmra.mrb[16].mxu1 %vm182_vm2, %v1649_v58 }
0x20fd   :  { %2515 = vmatpush3.bf16.msra.mxu1 %v2914_v50  ;;  %2401 = vmatprep.mubr.msk.f32.mxu1 %vm2659_vm1, %v2660_v4 }
0x20fe   :  { %2516 = vmatprep.subr.bf16.mxu1 %v2658_v0 }
0x2101   :  { %2518 = vmatpush3.bf16.msra.mxu1 %v2924_v53 }
0x21cf   :  { %v1718_v62 = vpop.f32.mrb[16].mxu1 }
0x21d0   :  { %v1722_v63 = vadd.f32 %v1718_v62, %v1139_v61  ;;  %v2381_v1 = vpop.f32.mrb[17].mxu1 }
0x21d2   :  { %2634 = vtanh.f32 %v1722_v63  ;;  %v2081_v3 = vmul.f32 -1.442695, %v1722_v63 }
0x21d4   :  { %2636 = vpow2.f32 %v2081_v3 }
0x21dc   :  { %v2635_v2 = vpop.eup %2634 }
0x21dd   :  { %1732 = vrot.lane.b32.xlu0 %v2635_v2, %s2661_s23 }
0x21de   :  { %v2637_v50 = vpop.eup %2636 }
0x21df   :  { %v1726_v6 = vadd.f32 1.0, %v2637_v50 }
0x21e1   :  { %2638 = vrcp.f32 %v1726_v6 }
0x21eb   :  { %v2639_v7 = vpop.eup %2638 }
0x21ec   :  { %v1730_v53 = vmul.f32 %v2639_v7, %v1640_v38 }
0x224f   :  { %v1733_v10 = vpop.permute.xlu0 %1732 }
0x2250   :  { %v1735_v8 = vmul.f32 %v2639_v7, %v1733_v10 }
0x2252   :  { %1737 = vrot.lane.b32.xlu1 %v1735_v8, %s2662_s3 }
0x22c4   :  { %v1738_v12 = vpop.permute.xlu1 %1737 }
0x22c5   :  { %v1740_v37 = vadd.f32 %v1738_v12, %v1730_v53 }
0x22c7   :  { %2640 = vtanh.f32 %v1740_v37 }
0x22d1   :  { %v2641_v59 = vpop.eup %2640 }
0x22d2   :  { %1743 = vrot.lane.b32.xlu0 %v2641_v59, %s2661_s23 }
0x2344   :  { %v1744_v9 = vpop.permute.xlu0 %1743 }
0x2345   :  { %v1746_v57 = vmul.f32 %v2639_v7, %v1744_v9 }
0x2347   :  { %1748 = vrot.lane.b32.xlu1 %v1746_v57, %s2662_s3 }
0x23b9   :  { %v1749_v11 = vpop.permute.xlu1 %1748 }
0x23ba   :  { %2391 = vmatmul.mubr.msk.f32.vlgmr.msra.gmra.mrb[26].mxu0 %vm182_vm2, %v1749_v11 }
0x23bb   :  { %2412 = vmatprep.mubr.msk.f32.mxu0 %vm2659_vm1, %v2660_v4  ;;  %2521 = vmatpush3.bf16.msra.mxu0 %v2520_v32 }
0x23bc   :  { %2522 = vmatprep.subr.bf16.mxu0 %v2658_v0 }
0x23bf   :  { %2524 = vmatpush3.bf16.msra.mxu0 %v2523_v47 }
0x248d   :  { %v1818_v13 = vpop.f32.mrb[26].mxu0 }
0x248e   :  { %v1822_v14 = vadd.f32 %v1818_v13, %v1144_v36  ;;  %v2392_v15 = vpop.f32.mrb[27].mxu0 }
0x2490   :  { %2642 = vtanh.f32 %v1822_v14  ;;  %v2083_v17 = vmul.f32 -1.442695, %v1822_v14 }
0x2492   :  { %2644 = vpow2.f32 %v2083_v17 }
0x249a   :  { %v2643_v16 = vpop.eup %2642 }
0x249b   :  { %1832 = vrot.lane.b32.xlu0 %v2643_v16, %s2661_s23 }
0x249c   :  { %v2645_v18 = vpop.eup %2644 }
0x249d   :  { %v1826_v19 = vadd.f32 1.0, %v2645_v18 }
0x249f   :  { %2646 = vrcp.f32 %v1826_v19 }
0x24a9   :  { %v2647_v20 = vpop.eup %2646 }
0x24aa   :  { %v1830_v4 = vmul.f32 %v2647_v20, %v1740_v37 }
0x250d   :  { %v1833_v21 = vpop.permute.xlu0 %1832 }
0x250e   :  { %v1835_v22 = vmul.f32 %v2647_v20, %v1833_v21 }
0x2510   :  { %1837 = vrot.lane.b32.xlu1 %v1835_v22, %s2662_s3 }
0x2582   :  { %v1838_v23 = vpop.permute.xlu1 %1837 }
0x2583   :  { %v1840_v56 = vadd.f32 %v1838_v23, %v1830_v4 }
0x2585   :  { %2648 = vtanh.f32 %v1840_v56 }
0x258f   :  { %v2649_v24 = vpop.eup %2648 }
0x2590   :  { %1843 = vrot.lane.b32.xlu0 %v2649_v24, %s2661_s23 }
0x2602   :  { %v1844_v25 = vpop.permute.xlu0 %1843 }
0x2603   :  { %v1846_v26 = vmul.f32 %v2647_v20, %v1844_v25 }
0x2605   :  { %1848 = vrot.lane.b32.xlu1 %v1846_v26, %s2662_s3 }
0x2677   :  { %v1849_v27 = vpop.permute.xlu1 %1848 }
0x2678   :  { %2402 = vmatmul.mubr.msk.f32.vlgmr.msra.gmra.mrb[18].mxu1 %vm182_vm2, %v1849_v27 }
0x274b   :  { %v1918_v29 = vpop.f32.mrb[18].mxu1 }
0x274c   :  { %v1922_v34 = vadd.f32 %v1918_v29, %v1149_v28  ;;  %v2403_v30 = vpop.f32.mrb[19].mxu1 }
0x274e   :  { %2650 = vtanh.f32 %v1922_v34  ;;  %v2085_v33 = vmul.f32 -1.442695, %v1922_v34 }
0x2750   :  { %2652 = vpow2.f32 %v2085_v33 }
0x2758   :  { %v2651_v31 = vpop.eup %2650 }
0x2759   :  { %1932 = vrot.lane.b32.xlu0 %v2651_v31, %s2661_s23 }
0x275a   :  { %v2653_v35 = vpop.eup %2652 }
0x275b   :  { %v1926_v39 = vadd.f32 1.0, %v2653_v35 }
0x275d   :  { %2654 = vrcp.f32 %v1926_v39 }
0x2767   :  { %v2655_v60 = vpop.eup %2654 }
0x2768   :  { %v1930_v42 = vmul.f32 %v2655_v60, %v1840_v56 }
0x27cb   :  { %v1933_v40 = vpop.permute.xlu0 %1932 }
0x27cc   :  { %v1935_v41 = vmul.f32 %v2655_v60, %v1933_v40 }
0x27ce   :  { %1937 = vrot.lane.b32.xlu1 %v1935_v41, %s2662_s3 }
0x2840   :  { %v1938_v43 = vpop.permute.xlu1 %1937 }
0x2841   :  { %v1940_v5 = vadd.f32 %v1938_v43, %v1930_v42 }
0x2843   :  { %2656 = vtanh.f32 %v1940_v5 }
0x284d   :  { %v2657_v48 = vpop.eup %2656 }
0x284e   :  { %1943 = vrot.lane.b32.xlu0 %v2657_v48, %s2661_s23 }
0x28c0   :  { %v1944_v49 = vpop.permute.xlu0 %1943 }
0x28c1   :  { %v1946_v38 = vmul.f32 %v2655_v60, %v1944_v49 }
0x28c3   :  { %1959 = vrot.lane.b32.xlu1 %v1946_v38, %s2662_s3 }
0x2935   :  { %v1960_v51 = vpop.permute.xlu1 %1959 }
0x2936   :  { %2413 = vmatmul.mubr.msk.f32.vlgmr.msra.gmra.mrb[28].mxu0 %vm182_vm2, %v1960_v51 }
0x2a09   :  { %v2029_v55 = vpop.f32.mrb[28].mxu0 }
0x2a0a   :  { %v2030_v58 = vadd.f32 %v2086_v52, %v2029_v55  ;;  %v2414_v61 = vpop.f32.mrb[29].mxu0 }
0x2a0c   :  { %2033 = vst [vmem:[%s3079_s9] sm:$0xff] %v2030_v58 }

</bundles_post_ra>
